<compile_context>
chip_gen: v6e
topology: v6e:2x2x1
jax: 0.10.0
libtpu: 0.0.40
codegen_flags: <defaults>
</compile_context>

<pallas_src>
import functools

import jax
import jax.numpy as jnp
from jax import lax
from jax.experimental import pallas as pl
from jax.experimental.pallas import tpu as pltpu

_LANE = 128
_SUBLANE = 8


def _ceil_to(x, m):
    return ((x + m - 1) // m) * m


def _pad2d(a, rows, cols):
    r, c = a.shape
    return jnp.pad(a, ((0, rows - r), (0, cols - c)))


def _pick_tile(n, target, quantum):
    """Largest multiple of `quantum` <= target that divides n; else n (no tiling)."""
    if n <= target:
        return n
    t = (target // quantum) * quantum
    while t >= quantum:
        if n % t == 0:
            return t
        t -= quantum
    return n


def _vmem_limit(need_bytes):
    # Headroom over the computed block/scratch need; capped below v7x's
    # 64 MiB physical VMEM (v5e/v6e have 128 MiB, so 48 MiB is safe everywhere).
    return int(min(max(3 * need_bytes + (2 << 20), 16 << 20), 48 << 20))


# --------------------------- tiled GCN layer kernel ---------------------------

def _gcn_layer_kernel(adj_ref, in_ref, w_ref, b_ref, out_ref, acc_ref, *,
                      apply_relu, matmul_dtype):
    k = pl.program_id(1)

    @pl.when(k == 0)
    def _():
        acc_ref[...] = jnp.zeros_like(acc_ref)

    # acc += adj[i, k] @ feat[k]   (mmdt x mmdt -> f32 accumulate on the MXU)
    acc_ref[...] += jnp.dot(adj_ref[...], in_ref[...],
                            preferred_element_type=jnp.float32)

    @pl.when(k == pl.num_programs(1) - 1)
    def _():
        # out[i] = (adj @ feat)[i] @ W + b   (== adj @ (feat @ W) + b)
        y = jnp.dot(acc_ref[...].astype(matmul_dtype), w_ref[...],
                    preferred_element_type=jnp.float32) + b_ref[...]
        if apply_relu:
            y = jnp.maximum(y, 0.0)
        out_ref[...] = y.astype(out_ref.dtype)


def _gcn_layer(adjm, feat, w, b, *, out_dtype, apply_relu, tm, tk, matmul_dtype):
    n = adjm.shape[0]
    c_in = feat.shape[1]
    c_out = w.shape[1]
    grid = (n // tm, n // tk)

    bpe = jnp.dtype(matmul_dtype).itemsize
    need = (2 * tm * tk * bpe                                   # adj tile x2 bufs
            + 2 * tk * c_in * bpe                               # feat tile x2
            + 2 * tm * c_out * jnp.dtype(out_dtype).itemsize    # out tile x2
            + 2 * (c_in * c_out * bpe + c_out * 4)              # W, b
            + tm * c_in * 4)                                    # f32 acc scratch

    kern = functools.partial(_gcn_layer_kernel, apply_relu=apply_relu,
                             matmul_dtype=matmul_dtype)
    return pl.pallas_call(
        kern,
        out_shape=jax.ShapeDtypeStruct((n, c_out), out_dtype),
        grid=grid,
        in_specs=[pl.BlockSpec((tm, tk), lambda i, k: (i, k)),
                  pl.BlockSpec((tk, c_in), lambda i, k: (k, 0)),
                  pl.BlockSpec((c_in, c_out), lambda i, k: (0, 0)),
                  pl.BlockSpec((1, c_out), lambda i, k: (0, 0))],
        out_specs=pl.BlockSpec((tm, c_out), lambda i, k: (i, 0)),
        scratch_shapes=[pltpu.VMEM((tm, c_in), jnp.float32)],
        compiler_params=pltpu.CompilerParams(
            dimension_semantics=("parallel", "arbitrary"),
            vmem_limit_bytes=_vmem_limit(need)),
    )(adjm, feat, w, b)


# ------------------------------ soft k-means kernel ---------------------------

def _kmeans_kernel(emb_ref, mu0_ref, mu_ref, r_ref, dist_ref, *,
                   k_real, cluster_temp, num_iter):
    f32 = jnp.float32
    embeds = emb_ref[...].astype(f32)

    # Row L2-normalize (EUP rsqrt).
    inv_norm = lax.rsqrt(jnp.sum(embeds * embeds, axis=1, keepdims=True))
    data = embeds * inv_norm                                   # (N, Dp) unit rows

    n = data.shape[0]
    k_pad = r_ref.shape[1]

    # Hoisted masks/constants (JAX does not CSE broadcasts inside loops).
    k_mask = lax.broadcasted_iota(jnp.int32, (1, k_pad), 1) < k_real
    row_mask = lax.broadcasted_iota(jnp.int32, (k_pad, 1), 0) < k_real
    ones_n = jnp.ones((n, 1), f32)
    neg_big = jnp.float32(-1e30)          # mask value must stay f32 (overflows bf16)

    contract_feat = (((1,), (1,)), ((), ()))   # data(N,Dp) x mu(Kp,Dp) over Dp
    contract_node = (((0,), (0,)), ((), ()))   # r(N,Kp)   x data(N,Dp) over N

    # After one update mu rows are convex combinations of unit vectors, so
    # |temp * <data, mu>| <= temp and exp() is f32-safe without max-subtract
    # for temp <= ~80.  The first update (raw init, unbounded norm) and the
    # final returned r always keep the max-subtract.
    skip_inner_max = (cluster_temp <= 80.0)

    def kmeans_update(mu, subtract_max):
        # Fold cluster_temp into the tiny (Kp,Dp) mu, not the (N,Kp) logits.
        z = lax.dot_general(data, mu * cluster_temp, contract_feat,
                            preferred_element_type=f32)           # (N, Kp)
        z = jnp.where(k_mask, z, neg_big)                         # mask padded K
        if subtract_max:
            z = z - jnp.max(z, axis=1, keepdims=True)
        e = jnp.exp(z)
        r = e * pl.reciprocal(jnp.sum(e, axis=1, keepdims=True), approx=True)
        # r.T @ data and r.T @ 1 without explicit transposes (stay on the MXU).
        cluster_mean = lax.dot_general(r, data, contract_node,
                                       preferred_element_type=f32)    # (Kp, Dp)
        cluster_r = lax.dot_general(r, ones_n, contract_node,
                                    preferred_element_type=f32)       # (Kp, 1)
        # EUP reciprocal of a (Kp,1) vector + multiply instead of a (Kp,Dp) divide.
        new_mu = cluster_mean * pl.reciprocal(cluster_r, approx=True)
        return jnp.where(row_mask, new_mu, 0.0)     # keep padded cluster rows 0

    # First cluster() call: num_iter updates starting from self.init.
    mu = mu0_ref[...]
    if num_iter >= 1:
        mu = kmeans_update(mu, subtract_max=True)       # init rows not unit-norm
        if num_iter >= 2:
            unroll = True if num_iter <= 4 else 2       # cap unroll: no DMA to hide
            mu = lax.fori_loop(
                1, num_iter,
                lambda _, m: kmeans_update(m, subtract_max=not skip_inner_max),
                mu, unroll=unroll)
    # Second cluster() call: exactly one more update from (detached) mu_init.
    mu = kmeans_update(mu, subtract_max=(num_iter == 0) or not skip_inner_max)
    mu_ref[...] = mu.astype(mu_ref.dtype)

    # Final soft assignment; the module returns the *unscaled* dist.
    dist = lax.dot_general(data, mu, contract_feat, preferred_element_type=f32)
    z = jnp.where(k_mask, cluster_temp * dist, neg_big)
    z = z - jnp.max(z, axis=1, keepdims=True)
    e = jnp.exp(z)
    inv = 1.0 / jnp.sum(e, axis=1, keepdims=True)   # exact (N,1) divide, then mul
    r_ref[...] = (e * inv).astype(r_ref.dtype)
    dist_ref[...] = dist.astype(dist_ref.dtype)


def _kmeans(embeds_p, mu0p, *, k_real, cluster_temp, num_iter):
    n, dp = embeds_p.shape
    kp = mu0p.shape[0]
    need = (n * dp + 2 * kp * dp + 2 * n * kp) * 4
    kern = functools.partial(_kmeans_kernel, k_real=k_real,
                             cluster_temp=cluster_temp, num_iter=num_iter)
    out_shapes = (jax.ShapeDtypeStruct((kp, dp), jnp.float32),   # mu
                  jax.ShapeDtypeStruct((n, kp), jnp.float32),    # r
                  jax.ShapeDtypeStruct((n, kp), jnp.float32))    # dist
    # Grid-less single invocation: whole arrays get ONE VMEM buffer each
    # (nothing to pipeline, so no double-buffering of the (N,Dp) data).
    return pl.pallas_call(
        kern,
        out_shape=out_shapes,
        compiler_params=pltpu.CompilerParams(
            vmem_limit_bytes=_vmem_limit(need)),
    )(embeds_p, mu0p)


# -------------------------------- python wrapper ------------------------------

def gcn_clusternet_forward(x, adj, params, K, cluster_temp, num_iter=1,
                           matmul_dtype=jnp.bfloat16, tile_m=256, tile_k=256):
    """GCNClusterNet.forward(x, adj, num_iter) -> (mu, r, embeds, dist).

    matmul_dtype controls only the GCN MXU inputs (f32 accumulation); all
    k-means / softmax math stays f32.  Pass jnp.float32 to track the PyTorch
    reference numerics most closely.
    """
    n, nfeat = x.shape
    w1, b1, w2, b2, mu0 = (params["w1"], params["b1"], params["w2"],
                           params["b2"], params["init"])
    nhid = w1.shape[1]
    nout = w2.shape[1]

    fp = _ceil_to(nfeat, _LANE)
    hp = _ceil_to(nhid, _LANE)
    dp = _ceil_to(nout, _LANE)
    kp = _ceil_to(K, _LANE)

    # Cast matmul operands in the wrapper (halves adj/x/h DMA bytes when bf16
    # and removes in-kernel VPU casts).  Biases / init stay f32.
    mmdt = matmul_dtype
    adjm = adj.astype(mmdt)
    xp = _pad2d(x.astype(jnp.float32), n, fp).astype(mmdt)
    w1p = _pad2d(w1.astype(jnp.float32), fp, hp).astype(mmdt)
    w2p = _pad2d(w2.astype(jnp.float32), hp, dp).astype(mmdt)
    b1p = _pad2d(b1.reshape(1, -1).astype(jnp.float32), 1, hp)
    b2p = _pad2d(b2.reshape(1, -1).astype(jnp.float32), 1, dp)
    mu0p = _pad2d(mu0.astype(jnp.float32), kp, dp)

    # Node tiles: tm (row / parallel axis, multiple of 8), tk (contraction
    # axis, multiple of 128 or the full N).  256-deep contractions fill the
    # v6e/v7x 256x256 MXU and map to two passes of v5e's 128x128 MXU; the
    # resulting blocks stay well under v7x's 64 MiB physical VMEM.
    tm = _pick_tile(n, tile_m, _SUBLANE)
    tk = _pick_tile(n, tile_k, _LANE)

    # GCN layer 1: h = relu((adj @ x) @ W1 + b1)   (== relu(adj @ (x@W1) + b1))
    h = _gcn_layer(adjm, xp, w1p, b1p, out_dtype=mmdt, apply_relu=True,
                   tm=tm, tk=tk, matmul_dtype=mmdt)
    # TODO(synk): training-mode dropout is stochastic; eval-mode identity used.

    # GCN layer 2: embeds = (adj @ h) @ W2 + b2  (f32 output for k-means/return)
    embeds_p = _gcn_layer(adjm, h, w2p, b2p, out_dtype=jnp.float32,
                          apply_relu=False, tm=tm, tk=tk, matmul_dtype=mmdt)

    # Soft k-means: num_iter + 1 updates and the final assignment, one kernel.
    mu_p, r_p, dist_p = _kmeans(embeds_p, mu0p, k_real=int(K),
                                cluster_temp=float(cluster_temp),
                                num_iter=int(num_iter))

    # Slice padding away (cheap XLA slices in the wrapper).
    return (mu_p[:K, :nout], r_p[:, :K], embeds_p[:, :nout], dist_p[:, :K])


# ------------------------------------ main ------------------------------------

if __name__ == "__main__":
    N = 64          # number of nodes
    NFEAT = 32
    NHID = 32
    NOUT = 16
    K = 8
    CLUSTER_TEMP = 30.0
    NUM_ITER = 3

    key = jax.random.PRNGKey(0)
    k_x, k_adj, k_w1, k_w2, k_init = jax.random.split(key, 5)

    # Node features
    x = jax.random.normal(k_x, (N, NFEAT), dtype=jnp.float32)

    # Random symmetric adjacency with self loops, row-normalized (dense)
    a = (jax.random.uniform(k_adj, (N, N)) < 0.1).astype(jnp.float32)
    a = jnp.maximum(a, a.T) + jnp.eye(N, dtype=jnp.float32)
    adj = a / jnp.sum(a, axis=1, keepdims=True)

    def glorot(k_, shape):
        lim = (6.0 / (shape[0] + shape[1])) ** 0.5
        return jax.random.uniform(k_, shape, jnp.float32, minval=-lim, maxval=lim)

    params = {
        "w1": glorot(k_w1, (NFEAT, NHID)),
        "b1": jnp.zeros((NHID,), jnp.float32),
        "w2": glorot(k_w2, (NHID, NOUT)),
        "b2": jnp.zeros((NOUT,), jnp.float32),
        # self.init = torch.rand(K, nout)  -> uniform [0, 1)
        "init": jax.random.uniform(k_init, (K, NOUT), dtype=jnp.float32),
        # self.distmult exists in __init__ but is unused in forward
    }

    # bf16 MXU inputs (f32 accumulate) by default for v6e/v7x throughput;
    # k-means/softmax math stays f32.  Use matmul_dtype=jnp.float32 for the
    # closest match to the PyTorch reference numerics.
    fwd = jax.jit(functools.partial(
        gcn_clusternet_forward, K=K, cluster_temp=CLUSTER_TEMP,
        num_iter=NUM_ITER, matmul_dtype=jnp.bfloat16))

    mu, r, embeds, dist = fwd(x, adj, params)
    jax.block_until_ready((mu, r, embeds, dist))

    assert mu.shape == (K, NOUT)
    assert r.shape == (N, K)
    assert embeds.shape == (N, NOUT)
    assert dist.shape == (N, K)
    assert bool(jnp.all(jnp.isfinite(mu)))
    assert bool(jnp.all(jnp.isfinite(r)))
    assert bool(jnp.all(jnp.isfinite(embeds)))
    assert bool(jnp.all(jnp.isfinite(dist)))
    # soft assignments sum to 1 per node
    assert bool(jnp.allclose(jnp.sum(r, axis=1), 1.0, atol=1e-4))

    print("KERNEL_OK")
</pallas_src>

<mosaic_0001>
module attributes {stable_mosaic.version = 11 : i64} {
  func.func @_gcn_layer_kernel(%arg0: i32, %arg1: i32, %arg2: memref<64x64xbf16, #tpu.memory_space<vmem>>, %arg3: memref<64x128xbf16, #tpu.memory_space<vmem>>, %arg4: memref<128x128xbf16, #tpu.memory_space<vmem>>, %arg5: memref<1x128xf32, #tpu.memory_space<vmem>>, %arg6: memref<64x128xbf16, #tpu.memory_space<vmem>>, %arg7: memref<64x128xf32, #tpu.memory_space<vmem>>) attributes {dimension_semantics = [#tpu.dimension_semantics<parallel>, #tpu.dimension_semantics<arbitrary>], iteration_bounds = array<i64: 1, 1>, scalar_prefetch = 0 : i64, scratch_operands = 1 : i64, tpu.core_type = #tpu.core_type<tc>, window_params = [{transform_indices = @transform_0, window_bounds = array<i64: 64, 64>}, {transform_indices = @transform_1, window_bounds = array<i64: 64, 128>}, {pipeline_mode = #tpu.pipeline_mode<synchronous>, transform_indices = @transform_2, window_bounds = array<i64: 128, 128>}, {pipeline_mode = #tpu.pipeline_mode<synchronous>, transform_indices = @transform_3, window_bounds = array<i64: 1, 128>}, {transform_indices = @transform_4, window_bounds = array<i64: 64, 128>}]} {
    %c0_i32 = arith.constant 0 : i32
    %0 = arith.cmpi eq, %arg1, %c0_i32 : i32
    %1 = arith.extui %0 : i1 to i32
    %c0_i32_0 = arith.constant 0 : i32
    %2 = arith.cmpi ne, %1, %c0_i32_0 : i32
    scf.if %2 {
      %cst_10 = arith.constant 0.000000e+00 : f32
      %12 = vector.broadcast %cst_10 : f32 to vector<64x128xf32>
      %c0_11 = arith.constant 0 : index
      %c0_12 = arith.constant 0 : index
      %13 = vector.load %arg7[%c0_11, %c0_12] : memref<64x128xf32, #tpu.memory_space<vmem>>, vector<64x128xf32>
      tpu.vector_store %arg7[%c0_11, %c0_12], %12 {strides = array<i32>} : memref<64x128xf32, #tpu.memory_space<vmem>>, vector<64x128xf32>,
    } else {
    }
    %c0 = arith.constant 0 : index
    %c0_1 = arith.constant 0 : index
    %3 = vector.load %arg7[%c0, %c0_1] : memref<64x128xf32, #tpu.memory_space<vmem>>, vector<64x128xf32>
    %c0_2 = arith.constant 0 : index
    %c0_3 = arith.constant 0 : index
    %4 = vector.load %arg2[%c0_2, %c0_3] : memref<64x64xbf16, #tpu.memory_space<vmem>>, vector<64x64xbf16>
    %c0_4 = arith.constant 0 : index
    %c0_5 = arith.constant 0 : index
    %5 = vector.load %arg3[%c0_4, %c0_5] : memref<64x128xbf16, #tpu.memory_space<vmem>>, vector<64x128xbf16>
    %cst = arith.constant dense<0.000000e+00> : vector<64x128xf32>
    %6 = tpu.matmul %4, %5, %cst {dimension_numbers = #tpu.dot_dimension_numbers<[1], [0], [0], [1], [0, 0, 1, 1], [], []>} : vector<64x64xbf16>, vector<64x128xbf16>, vector<64x128xf32> -> vector<64x128xf32>
    %7 = arith.addf %3, %6 : vector<64x128xf32>
    %c0_6 = arith.constant 0 : index
    %c0_7 = arith.constant 0 : index
    %8 = vector.load %arg7[%c0_6, %c0_7] : memref<64x128xf32, #tpu.memory_space<vmem>>, vector<64x128xf32>
    tpu.vector_store %arg7[%c0_6, %c0_7], %7 {strides = array<i32>} : memref<64x128xf32, #tpu.memory_space<vmem>>, vector<64x128xf32>,
    %c0_i32_8 = arith.constant 0 : i32
    %9 = arith.cmpi eq, %arg1, %c0_i32_8 : i32
    %10 = arith.extui %9 : i1 to i32
    %c0_i32_9 = arith.constant 0 : i32
    %11 = arith.cmpi ne, %10, %c0_i32_9 : i32
    scf.if %11 {
      %c0_10 = arith.constant 0 : index
      %c0_11 = arith.constant 0 : index
      %12 = vector.load %arg7[%c0_10, %c0_11] : memref<64x128xf32, #tpu.memory_space<vmem>>, vector<64x128xf32>
      %13 = arith.truncf %12 : vector<64x128xf32> to vector<64x128xbf16>
      %c0_12 = arith.constant 0 : index
      %c0_13 = arith.constant 0 : index
      %14 = vector.load %arg4[%c0_12, %c0_13] : memref<128x128xbf16, #tpu.memory_space<vmem>>, vector<128x128xbf16>
      %cst_14 = arith.constant dense<0.000000e+00> : vector<64x128xf32>
      %15 = tpu.matmul %13, %14, %cst_14 {dimension_numbers = #tpu.dot_dimension_numbers<[1], [0], [0], [1], [0, 0, 1, 1], [], []>} : vector<64x128xbf16>, vector<128x128xbf16>, vector<64x128xf32> -> vector<64x128xf32>
      %c0_15 = arith.constant 0 : index
      %c0_16 = arith.constant 0 : index
      %16 = vector.load %arg5[%c0_15, %c0_16] : memref<1x128xf32, #tpu.memory_space<vmem>>, vector<1x128xf32>
      %17 = vector.broadcast %16 : vector<1x128xf32> to vector<64x128xf32>
      %18 = arith.addf %15, %17 : vector<64x128xf32>
      %cst_17 = arith.constant 0.000000e+00 : f32
      %19 = vector.broadcast %cst_17 : f32 to vector<64x128xf32>
      %20 = arith.maximumf %18, %19 : vector<64x128xf32>
      %21 = arith.truncf %20 : vector<64x128xf32> to vector<64x128xbf16>
      %c0_18 = arith.constant 0 : index
      %c0_19 = arith.constant 0 : index
      %22 = vector.load %arg6[%c0_18, %c0_19] : memref<64x128xbf16, #tpu.memory_space<vmem>>, vector<64x128xbf16>
      tpu.vector_store %arg6[%c0_18, %c0_19], %21 {strides = array<i32>} : memref<64x128xbf16, #tpu.memory_space<vmem>>, vector<64x128xbf16>,
    } else {
    }
    return
  }
  func.func @transform_0(%arg0: i32, %arg1: i32) -> (i32, i32) {
    %c0_i32 = arith.constant 0 : i32
    return %arg0, %arg1 : i32, i32
  }
  func.func @transform_1(%arg0: i32, %arg1: i32) -> (i32, i32) {
    %c0_i32 = arith.constant 0 : i32
    %c0_i32_0 = arith.constant 0 : i32
    return %arg1, %c0_i32 : i32, i32
  }
  func.func @transform_2(%arg0: i32, %arg1: i32) -> (i32, i32) {
    %c0_i32 = arith.constant 0 : i32
    %c0_i32_0 = arith.constant 0 : i32
    %c0_i32_1 = arith.constant 0 : i32
    return %c0_i32, %c0_i32_0 : i32, i32
  }
  func.func @transform_3(%arg0: i32, %arg1: i32) -> (i32, i32) {
    %c0_i32 = arith.constant 0 : i32
    %c0_i32_0 = arith.constant 0 : i32
    %c0_i32_1 = arith.constant 0 : i32
    return %c0_i32, %c0_i32_0 : i32, i32
  }
  func.func @transform_4(%arg0: i32, %arg1: i32) -> (i32, i32) {
    %c0_i32 = arith.constant 0 : i32
    %c0_i32_0 = arith.constant 0 : i32
    return %arg0, %c0_i32 : i32, i32
  }
}

module attributes {stable_mosaic.version = 11 : i64} {
  func.func @_gcn_layer_kernel(%arg0: i32, %arg1: i32, %arg2: memref<64x64xbf16, #tpu.memory_space<vmem>>, %arg3: memref<64x128xbf16, #tpu.memory_space<vmem>>, %arg4: memref<128x128xbf16, #tpu.memory_space<vmem>>, %arg5: memref<1x128xf32, #tpu.memory_space<vmem>>, %arg6: memref<64x128xf32, #tpu.memory_space<vmem>>, %arg7: memref<64x128xf32, #tpu.memory_space<vmem>>) attributes {dimension_semantics = [#tpu.dimension_semantics<parallel>, #tpu.dimension_semantics<arbitrary>], iteration_bounds = array<i64: 1, 1>, scalar_prefetch = 0 : i64, scratch_operands = 1 : i64, tpu.core_type = #tpu.core_type<tc>, window_params = [{transform_indices = @transform_0, window_bounds = array<i64: 64, 64>}, {transform_indices = @transform_1, window_bounds = array<i64: 64, 128>}, {pipeline_mode = #tpu.pipeline_mode<synchronous>, transform_indices = @transform_2, window_bounds = array<i64: 128, 128>}, {pipeline_mode = #tpu.pipeline_mode<synchronous>, transform_indices = @transform_3, window_bounds = array<i64: 1, 128>}, {transform_indices = @transform_4, window_bounds = array<i64: 64, 128>}]} {
    %c0_i32 = arith.constant 0 : i32
    %0 = arith.cmpi eq, %arg1, %c0_i32 : i32
    %1 = arith.extui %0 : i1 to i32
    %c0_i32_0 = arith.constant 0 : i32
    %2 = arith.cmpi ne, %1, %c0_i32_0 : i32
    scf.if %2 {
      %cst_10 = arith.constant 0.000000e+00 : f32
      %12 = vector.broadcast %cst_10 : f32 to vector<64x128xf32>
      %c0_11 = arith.constant 0 : index
      %c0_12 = arith.constant 0 : index
      %13 = vector.load %arg7[%c0_11, %c0_12] : memref<64x128xf32, #tpu.memory_space<vmem>>, vector<64x128xf32>
      tpu.vector_store %arg7[%c0_11, %c0_12], %12 {strides = array<i32>} : memref<64x128xf32, #tpu.memory_space<vmem>>, vector<64x128xf32>,
    } else {
    }
    %c0 = arith.constant 0 : index
    %c0_1 = arith.constant 0 : index
    %3 = vector.load %arg7[%c0, %c0_1] : memref<64x128xf32, #tpu.memory_space<vmem>>, vector<64x128xf32>
    %c0_2 = arith.constant 0 : index
    %c0_3 = arith.constant 0 : index
    %4 = vector.load %arg2[%c0_2, %c0_3] : memref<64x64xbf16, #tpu.memory_space<vmem>>, vector<64x64xbf16>
    %c0_4 = arith.constant 0 : index
    %c0_5 = arith.constant 0 : index
    %5 = vector.load %arg3[%c0_4, %c0_5] : memref<64x128xbf16, #tpu.memory_space<vmem>>, vector<64x128xbf16>
    %cst = arith.constant dense<0.000000e+00> : vector<64x128xf32>
    %6 = tpu.matmul %4, %5, %cst {dimension_numbers = #tpu.dot_dimension_numbers<[1], [0], [0], [1], [0, 0, 1, 1], [], []>} : vector<64x64xbf16>, vector<64x128xbf16>, vector<64x128xf32> -> vector<64x128xf32>
    %7 = arith.addf %3, %6 : vector<64x128xf32>
    %c0_6 = arith.constant 0 : index
    %c0_7 = arith.constant 0 : index
    %8 = vector.load %arg7[%c0_6, %c0_7] : memref<64x128xf32, #tpu.memory_space<vmem>>, vector<64x128xf32>
    tpu.vector_store %arg7[%c0_6, %c0_7], %7 {strides = array<i32>} : memref<64x128xf32, #tpu.memory_space<vmem>>, vector<64x128xf32>,
    %c0_i32_8 = arith.constant 0 : i32
    %9 = arith.cmpi eq, %arg1, %c0_i32_8 : i32
    %10 = arith.extui %9 : i1 to i32
    %c0_i32_9 = arith.constant 0 : i32
    %11 = arith.cmpi ne, %10, %c0_i32_9 : i32
    scf.if %11 {
      %c0_10 = arith.constant 0 : index
      %c0_11 = arith.constant 0 : index
      %12 = vector.load %arg7[%c0_10, %c0_11] : memref<64x128xf32, #tpu.memory_space<vmem>>, vector<64x128xf32>
      %13 = arith.truncf %12 : vector<64x128xf32> to vector<64x128xbf16>
      %c0_12 = arith.constant 0 : index
      %c0_13 = arith.constant 0 : index
      %14 = vector.load %arg4[%c0_12, %c0_13] : memref<128x128xbf16, #tpu.memory_space<vmem>>, vector<128x128xbf16>
      %cst_14 = arith.constant dense<0.000000e+00> : vector<64x128xf32>
      %15 = tpu.matmul %13, %14, %cst_14 {dimension_numbers = #tpu.dot_dimension_numbers<[1], [0], [0], [1], [0, 0, 1, 1], [], []>} : vector<64x128xbf16>, vector<128x128xbf16>, vector<64x128xf32> -> vector<64x128xf32>
      %c0_15 = arith.constant 0 : index
      %c0_16 = arith.constant 0 : index
      %16 = vector.load %arg5[%c0_15, %c0_16] : memref<1x128xf32, #tpu.memory_space<vmem>>, vector<1x128xf32>
      %17 = vector.broadcast %16 : vector<1x128xf32> to vector<64x128xf32>
      %18 = arith.addf %15, %17 : vector<64x128xf32>
      %c0_17 = arith.constant 0 : index
      %c0_18 = arith.constant 0 : index
      %19 = vector.load %arg6[%c0_17, %c0_18] : memref<64x128xf32, #tpu.memory_space<vmem>>, vector<64x128xf32>
      tpu.vector_store %arg6[%c0_17, %c0_18], %18 {strides = array<i32>} : memref<64x128xf32, #tpu.memory_space<vmem>>, vector<64x128xf32>,
    } else {
    }
    return
  }
  func.func @transform_0(%arg0: i32, %arg1: i32) -> (i32, i32) {
    %c0_i32 = arith.constant 0 : i32
    return %arg0, %arg1 : i32, i32
  }
  func.func @transform_1(%arg0: i32, %arg1: i32) -> (i32, i32) {
    %c0_i32 = arith.constant 0 : i32
    %c0_i32_0 = arith.constant 0 : i32
    return %arg1, %c0_i32 : i32, i32
  }
  func.func @transform_2(%arg0: i32, %arg1: i32) -> (i32, i32) {
    %c0_i32 = arith.constant 0 : i32
    %c0_i32_0 = arith.constant 0 : i32
    %c0_i32_1 = arith.constant 0 : i32
    return %c0_i32, %c0_i32_0 : i32, i32
  }
  func.func @transform_3(%arg0: i32, %arg1: i32) -> (i32, i32) {
    %c0_i32 = arith.constant 0 : i32
    %c0_i32_0 = arith.constant 0 : i32
    %c0_i32_1 = arith.constant 0 : i32
    return %c0_i32, %c0_i32_0 : i32, i32
  }
  func.func @transform_4(%arg0: i32, %arg1: i32) -> (i32, i32) {
    %c0_i32 = arith.constant 0 : i32
    %c0_i32_0 = arith.constant 0 : i32
    return %arg0, %c0_i32 : i32, i32
  }
}

module attributes {stable_mosaic.version = 11 : i64} {
  func.func @_kmeans_kernel(%arg0: memref<64x128xf32, #tpu.memory_space<vmem>>, %arg1: memref<128x128xf32, #tpu.memory_space<vmem>>, %arg2: memref<128x128xf32, #tpu.memory_space<vmem>>, %arg3: memref<64x128xf32, #tpu.memory_space<vmem>>, %arg4: memref<64x128xf32, #tpu.memory_space<vmem>>) attributes {dimension_semantics = [], scalar_prefetch = 0 : i64, scratch_operands = 0 : i64, tpu.core_type = #tpu.core_type<tc>} {
    %c0 = arith.constant 0 : index
    %c0_0 = arith.constant 0 : index
    %0 = vector.load %arg0[%c0, %c0_0] : memref<64x128xf32, #tpu.memory_space<vmem>>, vector<64x128xf32>
    %1 = arith.mulf %0, %0 : vector<64x128xf32>
    %cst = arith.constant dense<0.000000e+00> : vector<64xf32>
    %2 = vector.multi_reduction <add>, %1, %cst [1] : vector<64x128xf32> to vector<64xf32>
    %3 = vector.shape_cast %2 : vector<64xf32> to vector<64x1xf32>
    %4 = math.rsqrt %3 : vector<64x1xf32>
    %5 = vector.broadcast %4 : vector<64x1xf32> to vector<64x128xf32>
    %6 = arith.mulf %0, %5 : vector<64x128xf32>
    %7 = tpu.iota {dimensions = array<i32: 1>} : vector<1x128xi32>
    %c8_i32 = arith.constant 8 : i32
    %8 = vector.broadcast %c8_i32 : i32 to vector<1x128xi32>
    %9 = arith.cmpi slt, %7, %8 : vector<1x128xi32>
    %10 = tpu.iota {dimensions = array<i32: 0>} : vector<128x1xi32>
    %c8_i32_1 = arith.constant 8 : i32
    %11 = vector.broadcast %c8_i32_1 : i32 to vector<128x1xi32>
    %12 = arith.cmpi slt, %10, %11 : vector<128x1xi32>
    %cst_2 = arith.constant 1.000000e+00 : f32
    %13 = vector.broadcast %cst_2 : f32 to vector<64x1xf32>
    %c0_3 = arith.constant 0 : index
    %c0_4 = arith.constant 0 : index
    %14 = vector.load %arg1[%c0_3, %c0_4] : memref<128x128xf32, #tpu.memory_space<vmem>>, vector<128x128xf32>
    %cst_5 = arith.constant 3.000000e+01 : f32
    %15 = vector.broadcast %cst_5 : f32 to vector<128x128xf32>
    %16 = arith.mulf %14, %15 : vector<128x128xf32>
    %cst_6 = arith.constant dense<0.000000e+00> : vector<64x128xf32>
    %17 = tpu.matmul %6, %16, %cst_6 {dimension_numbers = #tpu.dot_dimension_numbers<[1], [1], [0], [0], [0, 0, 1, 0], [], []>} : vector<64x128xf32>, vector<128x128xf32>, vector<64x128xf32> -> vector<64x128xf32>
    %cst_7 = arith.constant -1.000000e+30 : f32
    %18 = vector.shape_cast %9 : vector<1x128xi1> to vector<1x128xi1>
    %19 = vector.broadcast %18 : vector<1x128xi1> to vector<64x128xi1>
    %20 = vector.broadcast %cst_7 : f32 to vector<64x128xf32>
    %21 = arith.select %19, %17, %20 : vector<64x128xi1>, vector<64x128xf32>
    %cst_8 = arith.constant dense<0xFF800000> : vector<64xf32>
    %22 = vector.multi_reduction <maximumf>, %21, %cst_8 [1] : vector<64x128xf32> to vector<64xf32>
    %23 = vector.shape_cast %22 : vector<64xf32> to vector<64x1xf32>
    %24 = vector.broadcast %23 : vector<64x1xf32> to vector<64x128xf32>
    %25 = arith.subf %21, %24 : vector<64x128xf32>
    %26 = math.exp %25 : vector<64x128xf32>
    %cst_9 = arith.constant dense<0.000000e+00> : vector<64xf32>
    %27 = vector.multi_reduction <add>, %26, %cst_9 [1] : vector<64x128xf32> to vector<64xf32>
    %28 = vector.shape_cast %27 : vector<64xf32> to vector<64x1xf32>
    %29 = tpu.reciprocal %28 {approx = true} : vector<64x1xf32> -> vector<64x1xf32>
    %30 = vector.broadcast %29 : vector<64x1xf32> to vector<64x128xf32>
    %31 = arith.mulf %26, %30 : vector<64x128xf32>
    %cst_10 = arith.constant dense<0.000000e+00> : vector<128x128xf32>
    %32 = tpu.matmul %31, %6, %cst_10 {dimension_numbers = #tpu.dot_dimension_numbers<[0], [0], [1], [1], [0, 1, 1, 1], [], []>} : vector<64x128xf32>, vector<64x128xf32>, vector<128x128xf32> -> vector<128x128xf32>
    %cst_11 = arith.constant dense<0.000000e+00> : vector<128x1xf32>
    %33 = tpu.matmul %31, %13, %cst_11 {dimension_numbers = #tpu.dot_dimension_numbers<[0], [0], [1], [1], [0, 1, 1, 1], [], []>} : vector<64x128xf32>, vector<64x1xf32>, vector<128x1xf32> -> vector<128x1xf32>
    %34 = tpu.reciprocal %33 {approx = true} : vector<128x1xf32> -> vector<128x1xf32>
    %35 = vector.broadcast %34 : vector<128x1xf32> to vector<128x128xf32>
    %36 = arith.mulf %32, %35 : vector<128x128xf32>
    %cst_12 = arith.constant 0.000000e+00 : f32
    %37 = vector.shape_cast %12 : vector<128x1xi1> to vector<128x1xi1>
    %38 = vector.broadcast %37 : vector<128x1xi1> to vector<128x128xi1>
    %39 = vector.broadcast %cst_12 : f32 to vector<128x128xf32>
    %40 = arith.select %38, %36, %39 : vector<128x128xi1>, vector<128x128xf32>
    %cst_13 = arith.constant -1.000000e+30 : f32
    %c0_i32 = arith.constant 0 : i32
    %cst_14 = arith.constant 3.000000e+01 : f32
    %41 = vector.broadcast %cst_14 : f32 to vector<128x128xf32>
    %42 = arith.mulf %40, %41 : vector<128x128xf32>
    %cst_15 = arith.constant dense<0.000000e+00> : vector<64x128xf32>
    %43 = tpu.matmul %6, %42, %cst_15 {dimension_numbers = #tpu.dot_dimension_numbers<[1], [1], [0], [0], [0, 0, 1, 0], [], []>} : vector<64x128xf32>, vector<128x128xf32>, vector<64x128xf32> -> vector<64x128xf32>
    %44 = vector.shape_cast %9 : vector<1x128xi1> to vector<1x128xi1>
    %45 = vector.broadcast %44 : vector<1x128xi1> to vector<64x128xi1>
    %46 = vector.broadcast %cst_13 : f32 to vector<64x128xf32>
    %47 = arith.select %45, %43, %46 : vector<64x128xi1>, vector<64x128xf32>
    %48 = math.exp %47 : vector<64x128xf32>
    %cst_16 = arith.constant dense<0.000000e+00> : vector<64xf32>
    %49 = vector.multi_reduction <add>, %48, %cst_16 [1] : vector<64x128xf32> to vector<64xf32>
    %50 = vector.shape_cast %49 : vector<64xf32> to vector<64x1xf32>
    %51 = tpu.reciprocal %50 {approx = true} : vector<64x1xf32> -> vector<64x1xf32>
    %52 = vector.broadcast %51 : vector<64x1xf32> to vector<64x128xf32>
    %53 = arith.mulf %48, %52 : vector<64x128xf32>
    %cst_17 = arith.constant dense<0.000000e+00> : vector<128x128xf32>
    %54 = tpu.matmul %53, %6, %cst_17 {dimension_numbers = #tpu.dot_dimension_numbers<[0], [0], [1], [1], [0, 1, 1, 1], [], []>} : vector<64x128xf32>, vector<64x128xf32>, vector<128x128xf32> -> vector<128x128xf32>
    %cst_18 = arith.constant dense<0.000000e+00> : vector<128x1xf32>
    %55 = tpu.matmul %53, %13, %cst_18 {dimension_numbers = #tpu.dot_dimension_numbers<[0], [0], [1], [1], [0, 1, 1, 1], [], []>} : vector<64x128xf32>, vector<64x1xf32>, vector<128x1xf32> -> vector<128x1xf32>
    %56 = tpu.reciprocal %55 {approx = true} : vector<128x1xf32> -> vector<128x1xf32>
    %57 = vector.broadcast %56 : vector<128x1xf32> to vector<128x128xf32>
    %58 = arith.mulf %54, %57 : vector<128x128xf32>
    %cst_19 = arith.constant 0.000000e+00 : f32
    %59 = vector.shape_cast %12 : vector<128x1xi1> to vector<128x1xi1>
    %60 = vector.broadcast %59 : vector<128x1xi1> to vector<128x128xi1>
    %61 = vector.broadcast %cst_19 : f32 to vector<128x128xf32>
    %62 = arith.select %60, %58, %61 : vector<128x128xi1>, vector<128x128xf32>
    %c1_i32 = arith.constant 1 : i32
    %cst_20 = arith.constant 3.000000e+01 : f32
    %63 = vector.broadcast %cst_20 : f32 to vector<128x128xf32>
    %64 = arith.mulf %62, %63 : vector<128x128xf32>
    %cst_21 = arith.constant dense<0.000000e+00> : vector<64x128xf32>
    %65 = tpu.matmul %6, %64, %cst_21 {dimension_numbers = #tpu.dot_dimension_numbers<[1], [1], [0], [0], [0, 0, 1, 0], [], []>} : vector<64x128xf32>, vector<128x128xf32>, vector<64x128xf32> -> vector<64x128xf32>
    %66 = vector.shape_cast %9 : vector<1x128xi1> to vector<1x128xi1>
    %67 = vector.broadcast %66 : vector<1x128xi1> to vector<64x128xi1>
    %68 = vector.broadcast %cst_13 : f32 to vector<64x128xf32>
    %69 = arith.select %67, %65, %68 : vector<64x128xi1>, vector<64x128xf32>
    %70 = math.exp %69 : vector<64x128xf32>
    %cst_22 = arith.constant dense<0.000000e+00> : vector<64xf32>
    %71 = vector.multi_reduction <add>, %70, %cst_22 [1] : vector<64x128xf32> to vector<64xf32>
    %72 = vector.shape_cast %71 : vector<64xf32> to vector<64x1xf32>
    %73 = tpu.reciprocal %72 {approx = true} : vector<64x1xf32> -> vector<64x1xf32>
    %74 = vector.broadcast %73 : vector<64x1xf32> to vector<64x128xf32>
    %75 = arith.mulf %70, %74 : vector<64x128xf32>
    %cst_23 = arith.constant dense<0.000000e+00> : vector<128x128xf32>
    %76 = tpu.matmul %75, %6, %cst_23 {dimension_numbers = #tpu.dot_dimension_numbers<[0], [0], [1], [1], [0, 1, 1, 1], [], []>} : vector<64x128xf32>, vector<64x128xf32>, vector<128x128xf32> -> vector<128x128xf32>
    %cst_24 = arith.constant dense<0.000000e+00> : vector<128x1xf32>
    %77 = tpu.matmul %75, %13, %cst_24 {dimension_numbers = #tpu.dot_dimension_numbers<[0], [0], [1], [1], [0, 1, 1, 1], [], []>} : vector<64x128xf32>, vector<64x1xf32>, vector<128x1xf32> -> vector<128x1xf32>
    %78 = tpu.reciprocal %77 {approx = true} : vector<128x1xf32> -> vector<128x1xf32>
    %79 = vector.broadcast %78 : vector<128x1xf32> to vector<128x128xf32>
    %80 = arith.mulf %76, %79 : vector<128x128xf32>
    %cst_25 = arith.constant 0.000000e+00 : f32
    %81 = vector.shape_cast %12 : vector<128x1xi1> to vector<128x1xi1>
    %82 = vector.broadcast %81 : vector<128x1xi1> to vector<128x128xi1>
    %83 = vector.broadcast %cst_25 : f32 to vector<128x128xf32>
    %84 = arith.select %82, %80, %83 : vector<128x128xi1>, vector<128x128xf32>
    %cst_26 = arith.constant 3.000000e+01 : f32
    %85 = vector.broadcast %cst_26 : f32 to vector<128x128xf32>
    %86 = arith.mulf %84, %85 : vector<128x128xf32>
    %cst_27 = arith.constant dense<0.000000e+00> : vector<64x128xf32>
    %87 = tpu.matmul %6, %86, %cst_27 {dimension_numbers = #tpu.dot_dimension_numbers<[1], [1], [0], [0], [0, 0, 1, 0], [], []>} : vector<64x128xf32>, vector<128x128xf32>, vector<64x128xf32> -> vector<64x128xf32>
    %cst_28 = arith.constant -1.000000e+30 : f32
    %88 = vector.shape_cast %9 : vector<1x128xi1> to vector<1x128xi1>
    %89 = vector.broadcast %88 : vector<1x128xi1> to vector<64x128xi1>
    %90 = vector.broadcast %cst_28 : f32 to vector<64x128xf32>
    %91 = arith.select %89, %87, %90 : vector<64x128xi1>, vector<64x128xf32>
    %92 = math.exp %91 : vector<64x128xf32>
    %cst_29 = arith.constant dense<0.000000e+00> : vector<64xf32>
    %93 = vector.multi_reduction <add>, %92, %cst_29 [1] : vector<64x128xf32> to vector<64xf32>
    %94 = vector.shape_cast %93 : vector<64xf32> to vector<64x1xf32>
    %95 = tpu.reciprocal %94 {approx = true} : vector<64x1xf32> -> vector<64x1xf32>
    %96 = vector.broadcast %95 : vector<64x1xf32> to vector<64x128xf32>
    %97 = arith.mulf %92, %96 : vector<64x128xf32>
    %cst_30 = arith.constant dense<0.000000e+00> : vector<128x128xf32>
    %98 = tpu.matmul %97, %6, %cst_30 {dimension_numbers = #tpu.dot_dimension_numbers<[0], [0], [1], [1], [0, 1, 1, 1], [], []>} : vector<64x128xf32>, vector<64x128xf32>, vector<128x128xf32> -> vector<128x128xf32>
    %cst_31 = arith.constant dense<0.000000e+00> : vector<128x1xf32>
    %99 = tpu.matmul %97, %13, %cst_31 {dimension_numbers = #tpu.dot_dimension_numbers<[0], [0], [1], [1], [0, 1, 1, 1], [], []>} : vector<64x128xf32>, vector<64x1xf32>, vector<128x1xf32> -> vector<128x1xf32>
    %100 = tpu.reciprocal %99 {approx = true} : vector<128x1xf32> -> vector<128x1xf32>
    %101 = vector.broadcast %100 : vector<128x1xf32> to vector<128x128xf32>
    %102 = arith.mulf %98, %101 : vector<128x128xf32>
    %cst_32 = arith.constant 0.000000e+00 : f32
    %103 = vector.shape_cast %12 : vector<128x1xi1> to vector<128x1xi1>
    %104 = vector.broadcast %103 : vector<128x1xi1> to vector<128x128xi1>
    %105 = vector.broadcast %cst_32 : f32 to vector<128x128xf32>
    %106 = arith.select %104, %102, %105 : vector<128x128xi1>, vector<128x128xf32>
    %c0_33 = arith.constant 0 : index
    %c0_34 = arith.constant 0 : index
    %107 = vector.load %arg2[%c0_33, %c0_34] : memref<128x128xf32, #tpu.memory_space<vmem>>, vector<128x128xf32>
    tpu.vector_store %arg2[%c0_33, %c0_34], %106 {strides = array<i32>} : memref<128x128xf32, #tpu.memory_space<vmem>>, vector<128x128xf32>,
    %cst_35 = arith.constant dense<0.000000e+00> : vector<64x128xf32>
    %108 = tpu.matmul %6, %106, %cst_35 {dimension_numbers = #tpu.dot_dimension_numbers<[1], [1], [0], [0], [0, 0, 1, 0], [], []>} : vector<64x128xf32>, vector<128x128xf32>, vector<64x128xf32> -> vector<64x128xf32>
    %cst_36 = arith.constant 3.000000e+01 : f32
    %109 = vector.broadcast %cst_36 : f32 to vector<64x128xf32>
    %110 = arith.mulf %109, %108 : vector<64x128xf32>
    %cst_37 = arith.constant -1.000000e+30 : f32
    %111 = vector.shape_cast %9 : vector<1x128xi1> to vector<1x128xi1>
    %112 = vector.broadcast %111 : vector<1x128xi1> to vector<64x128xi1>
    %113 = vector.broadcast %cst_37 : f32 to vector<64x128xf32>
    %114 = arith.select %112, %110, %113 : vector<64x128xi1>, vector<64x128xf32>
    %cst_38 = arith.constant dense<0xFF800000> : vector<64xf32>
    %115 = vector.multi_reduction <maximumf>, %114, %cst_38 [1] : vector<64x128xf32> to vector<64xf32>
    %116 = vector.shape_cast %115 : vector<64xf32> to vector<64x1xf32>
    %117 = vector.broadcast %116 : vector<64x1xf32> to vector<64x128xf32>
    %118 = arith.subf %114, %117 : vector<64x128xf32>
    %119 = math.exp %118 : vector<64x128xf32>
    %cst_39 = arith.constant dense<0.000000e+00> : vector<64xf32>
    %120 = vector.multi_reduction <add>, %119, %cst_39 [1] : vector<64x128xf32> to vector<64xf32>
    %121 = vector.shape_cast %120 : vector<64xf32> to vector<64x1xf32>
    %cst_40 = arith.constant 1.000000e+00 : f32
    %122 = vector.broadcast %cst_40 : f32 to vector<64x1xf32>
    %123 = arith.divf %122, %121 : vector<64x1xf32>
    %124 = vector.broadcast %123 : vector<64x1xf32> to vector<64x128xf32>
    %125 = arith.mulf %119, %124 : vector<64x128xf32>
    %c0_41 = arith.constant 0 : index
    %c0_42 = arith.constant 0 : index
    %126 = vector.load %arg3[%c0_41, %c0_42] : memref<64x128xf32, #tpu.memory_space<vmem>>, vector<64x128xf32>
    tpu.vector_store %arg3[%c0_41, %c0_42], %125 {strides = array<i32>} : memref<64x128xf32, #tpu.memory_space<vmem>>, vector<64x128xf32>,
    %c0_43 = arith.constant 0 : index
    %c0_44 = arith.constant 0 : index
    %127 = vector.load %arg4[%c0_43, %c0_44] : memref<64x128xf32, #tpu.memory_space<vmem>>, vector<64x128xf32>
    tpu.vector_store %arg4[%c0_43, %c0_44], %108 {strides = array<i32>} : memref<64x128xf32, #tpu.memory_space<vmem>>, vector<64x128xf32>,
    return
  }
}

</mosaic_0001>

<bundles_post_ra>
// kernel: gcn_clusternet_forward.3
= control target key start
LH: loop header
LB: loop body
LE: loop exit
PB: predicated region body
PF: predicated region fallthrough
CT: control target
= control target key end

     0   :  { %vm98_vm0 = vcmask 523264   ;;  %s623_s1 = inlined_call_operand.vmem [shape: bf16[64,128], index: 1, kind: input, shape index: {}]   ;;  %s624_s0 = inlined_call_operand.vmem [shape: bf16[64,64], index: 0, kind: input, shape index: {}]   ;;  %s625_s2 = inlined_call_operand.vmem [shape: bf16[128,128], index: 2, kind: input, shape index: {}]   ;;  %s626_s3 = inlined_call_operand.vmem [shape: f32[1,128], index: 3, kind: input, shape index: {}]   ;;  %s627_s4 = inlined_call_operand.vmem [shape: bf16[64,128], index: 4, kind: output, shape index: {}]  }
   0x1   :  { %v515_v0 = vld [vmem:[%s623_s1 + $0x18] sm:$0xff]   ;;  %v516_v1 = vld [vmem:[%s623_s1 + $0x10] sm:$0xff]   ;;  %v517_v2 = vld [vmem:[%s623_s1 + $0x8] sm:$0xff]  }
   0x2   :  { %475 = vmatprep.subr.bf16.mxu0 %v515_v0  ;;  %v519_v3 = vld [vmem:[%s624_s0] sm:$0xff]   ;;  %v523_v5 = vld [vmem:[%s625_s2 + $0x38] sm:$0xff]   ;;  %v524_v6 = vld [vmem:[%s625_s2 + $0x30] sm:$0xff]  }
   0x3   :  { %476 = vmatpush3.bf16.msra.mxu0 %v515_v0  ;;  %483 = vmatprep.mubr.msk.bf16.mxu0 %vm98_vm0, %v519_v3  ;;  %v518_v4 = vld [vmem:[%s623_s1] sm:$0xff]   ;;  %v525_v7 = vld [vmem:[%s625_s2 + $0x28] sm:$0xff]   ;;  %v521_v9 = vld [vmem:[%s624_s0 + $0x10] sm:$0xff]  }
   0x4   :  { %477 = vmatprep.subr.bf16.mxu0 %v516_v1  ;;  %491 = vmatprep.subr.bf16.mxu1 %v523_v5  ;;  %v520_v8 = vld [vmem:[%s624_s0 + $0x8] sm:$0xff]   ;;  %v526_v10 = vld [vmem:[%s625_s2 + $0x20] sm:$0xff]   ;;  %v527_v11 = vld [vmem:[%s625_s2 + $0x18] sm:$0xff]  }
   0x5   :  { %492 = vmatpush3.bf16.msra.mxu1 %v523_v5  ;;  %v522_v12 = vld [vmem:[%s624_s0 + $0x18] sm:$0xff]   ;;  %v528_v13 = vld [vmem:[%s625_s2 + $0x10] sm:$0xff]   ;;  %v529_v14 = vld [vmem:[%s625_s2 + $0x8] sm:$0xff]  }
   0x6   :  { %493 = vmatprep.subr.bf16.mxu1 %v524_v6  ;;  %v530_v15 = vld [vmem:[%s625_s2] sm:$0xff]  }
   0x7   :  { %478 = vmatpush3.bf16.msra.mxu0 %v516_v1  ;;  %v407_v29 = vld [vmem:[%s626_s3] ss:$0 sm:$0xff] }
   0x8   :  { %479 = vmatprep.subr.bf16.mxu0 %v517_v2 }
   0x9   :  { %494 = vmatpush3.bf16.msra.mxu1 %v524_v6 }
   0xa   :  { %495 = vmatprep.subr.bf16.mxu1 %v525_v7 }
   0xb   :  { %480 = vmatpush3.bf16.msra.mxu0 %v517_v2 }
   0xc   :  { %481 = vmatprep.subr.bf16.mxu0 %v518_v4 }
   0xd   :  { %496 = vmatpush3.bf16.msra.mxu1 %v525_v7 }
   0xe   :  { %497 = vmatprep.subr.bf16.mxu1 %v526_v10 }
   0xf   :  { %482 = vmatpush3.bf16.msra.mxu0 %v518_v4 }
  0x11   :  { %498 = vmatpush3.bf16.msra.mxu1 %v526_v10 }
  0x12   :  { %484 = vmatmul.mubr.msk.bf16.vlgmr.msra.gmra.mxu0 %vm98_vm0, %v520_v8  ;;  %499 = vmatprep.subr.bf16.mxu1 %v527_v11 }
  0x13   :  { %487 = vmatprep.mubr.msk.bf16.mxu0 %vm98_vm0, %v521_v9 }
  0x15   :  { %500 = vmatpush3.bf16.msra.mxu1 %v527_v11 }
  0x16   :  { %501 = vmatprep.subr.bf16.mxu1 %v528_v13 }
  0x19   :  { %502 = vmatpush3.bf16.msra.mxu1 %v528_v13 }
  0x1a   :  { %488 = vmatmul.mubr.msk.bf16.gmra.mxu0 %vm98_vm0, %v522_v12  ;;  %503 = vmatprep.subr.bf16.mxu1 %v529_v14 }
  0x1d   :  { %504 = vmatpush3.bf16.msra.mxu1 %v529_v14 }
  0x1e   :  { %505 = vmatprep.subr.bf16.mxu1 %v530_v15 }
  0x21   :  { %506 = vmatpush3.bf16.msra.mxu1 %v530_v15 }
  0xd2   :  { %v485_v16 = vpop.f32.mrf.mxu0 }
  0xd4   :  { %v145_v17 = vpop.f32.mrf.mxu0 }
  0xd6   :  { %v486_v18 = vpop.f32.mrf.mxu0 }
  0xd7   :  { %v204_v21 = vpack.c.bf16 %v486_v18, %v485_v16 }
  0xd8   :  { %v148_v19 = vpop.f32.mrf.mxu0 }
  0xd9   :  { %v203_v20 = vpack.c.bf16 %v148_v19, %v145_v17 }
  0xda   :  { %v489_v22 = vpop.f32.mrf.mxu0 }
  0xdb   :  { %507 = vmatprep.mubr.bf16.mxu1 %v203_v20 }
  0xdc   :  { %v161_v23 = vpop.f32.mrf.mxu0  ;;  %508 = vmatmul.mubr.bf16.vlgmr.msra.gmra.mxu1 %v204_v21 }
  0xde   :  { %v490_v24 = vpop.f32.mrf.mxu0 }
  0xdf   :  { %v206_v27 = vpack.c.bf16 %v490_v24, %v489_v22 }
  0xe0   :  { %v164_v25 = vpop.f32.mrf.mxu0 }
  0xe1   :  { %v205_v26 = vpack.c.bf16 %v164_v25, %v161_v23 }
  0xe3   :  { %511 = vmatprep.mubr.bf16.mxu1 %v205_v26 }
  0xe4   :  { %512 = vmatmul.mubr.bf16.gmra.mxu1 %v206_v27 }
 0x19c   :  { %v509_v28 = vpop.f32.mrf.mxu1 }
 0x19d   :  { %v321_v31 = vadd.f32 %v509_v28, %v407_v29 }
 0x19e   :  { %v312_v30 = vpop.f32.mrf.mxu1 }
 0x19f   :  { %v313_v33 = vadd.f32 %v407_v29, %v312_v30  ;;  %v345_v36 = vmax.f32 %v321_v31, 0.0 }
 0x1a0   :  { %v510_v32 = vpop.f32.mrf.mxu1 }
 0x1a1   :  { %v324_v34 = vadd.f32 %v510_v32, %v407_v29  ;;  %v343_v40 = vmax.f32 %v313_v33, 0.0 }
 0x1a2   :  { %v315_v35 = vpop.f32.mrf.mxu1 }
 0x1a3   :  { %v346_v37 = vmax.f32 %v324_v34, 0.0  ;;  %v316_v38 = vadd.f32 %v407_v29, %v315_v35 }
 0x1a4   :  { %v513_v39 = vpop.f32.mrf.mxu1 }
 0x1a5   :  { %v440_v41 = vpack.c.bf16 %v346_v37, %v345_v36  ;;  %v344_v42 = vmax.f32 %v316_v38, 0.0  ;;  %v337_v45 = vadd.f32 %v513_v39, %v407_v29 }
 0x1a6   :  { %v328_v43 = vpop.f32.mrf.mxu1 }
 0x1a7   :  { %452 = vst [vmem:[%s627_s4 + $0x8] sm:$0xff] %v440_v41   ;;  %v435_v44 = vpack.c.bf16 %v344_v42, %v343_v40  ;;  %v329_v47 = vadd.f32 %v407_v29, %v328_v43  ;;  %v349_v50 = vmax.f32 %v337_v45, 0.0 }
 0x1a8   :  { %v514_v46 = vpop.f32.mrf.mxu1 }
 0x1a9   :  { %436 = vst [vmem:[%s627_s4] sm:$0xff] %v435_v44   ;;  %v340_v48 = vadd.f32 %v514_v46, %v407_v29  ;;  %v347_v53 = vmax.f32 %v329_v47, 0.0 }
 0x1aa   :  { %v331_v49 = vpop.f32.mrf.mxu1 }
 0x1ab   :  { %v350_v51 = vmax.f32 %v340_v48, 0.0  ;;  %v332_v52 = vadd.f32 %v407_v29, %v331_v49 }
 0x1ad   :  { %v450_v54 = vpack.c.bf16 %v350_v51, %v349_v50  ;;  %v348_v55 = vmax.f32 %v332_v52, 0.0 }
 0x1af   :  { %454 = vst [vmem:[%s627_s4 + $0x18] sm:$0xff] %v450_v54   ;;  %v445_v56 = vpack.c.bf16 %v348_v55, %v347_v53 }
 0x1b1   :  { %453 = vst [vmem:[%s627_s4 + $0x10] sm:$0xff] %v445_v56  }

// kernel: gcn_clusternet_forward.4
= control target key start
LH: loop header
LB: loop body
LE: loop exit
PB: predicated region body
PF: predicated region fallthrough
CT: control target
= control target key end

     0   :  { %vm98_vm0 = vcmask 523264   ;;  %s556_s1 = inlined_call_operand.vmem [shape: bf16[64,128], index: 1, kind: input, shape index: {}]   ;;  %s557_s0 = inlined_call_operand.vmem [shape: bf16[64,64], index: 0, kind: input, shape index: {}]   ;;  %s558_s2 = inlined_call_operand.vmem [shape: bf16[128,128], index: 2, kind: input, shape index: {}]   ;;  %s559_s3 = inlined_call_operand.vmem [shape: f32[1,128], index: 3, kind: input, shape index: {}]   ;;  %s560_s4 = inlined_call_operand.vmem [shape: f32[64,128], index: 4, kind: output, shape index: {}]  }
   0x1   :  { %v436_v0 = vld [vmem:[%s556_s1 + $0x18] sm:$0xff]   ;;  %v437_v1 = vld [vmem:[%s556_s1 + $0x10] sm:$0xff]   ;;  %v438_v2 = vld [vmem:[%s556_s1 + $0x8] sm:$0xff]  }
   0x2   :  { %396 = vmatprep.subr.bf16.mxu0 %v436_v0  ;;  %v440_v3 = vld [vmem:[%s557_s0] sm:$0xff]   ;;  %v444_v5 = vld [vmem:[%s558_s2 + $0x38] sm:$0xff]   ;;  %v445_v6 = vld [vmem:[%s558_s2 + $0x30] sm:$0xff]  }
   0x3   :  { %397 = vmatpush3.bf16.msra.mxu0 %v436_v0  ;;  %404 = vmatprep.mubr.msk.bf16.mxu0 %vm98_vm0, %v440_v3  ;;  %v439_v4 = vld [vmem:[%s556_s1] sm:$0xff]   ;;  %v446_v7 = vld [vmem:[%s558_s2 + $0x28] sm:$0xff]   ;;  %v442_v9 = vld [vmem:[%s557_s0 + $0x10] sm:$0xff]  }
   0x4   :  { %398 = vmatprep.subr.bf16.mxu0 %v437_v1  ;;  %412 = vmatprep.subr.bf16.mxu1 %v444_v5  ;;  %v441_v8 = vld [vmem:[%s557_s0 + $0x8] sm:$0xff]   ;;  %v447_v10 = vld [vmem:[%s558_s2 + $0x20] sm:$0xff]   ;;  %v448_v11 = vld [vmem:[%s558_s2 + $0x18] sm:$0xff]  }
   0x5   :  { %413 = vmatpush3.bf16.msra.mxu1 %v444_v5  ;;  %v443_v12 = vld [vmem:[%s557_s0 + $0x18] sm:$0xff]   ;;  %v449_v13 = vld [vmem:[%s558_s2 + $0x10] sm:$0xff]   ;;  %v450_v14 = vld [vmem:[%s558_s2 + $0x8] sm:$0xff]  }
   0x6   :  { %414 = vmatprep.subr.bf16.mxu1 %v445_v6  ;;  %v451_v15 = vld [vmem:[%s558_s2] sm:$0xff]  }
   0x7   :  { %399 = vmatpush3.bf16.msra.mxu0 %v437_v1  ;;  %v367_v28 = vld [vmem:[%s559_s3] ss:$0 sm:$0xff] }
   0x8   :  { %400 = vmatprep.subr.bf16.mxu0 %v438_v2 }
   0x9   :  { %415 = vmatpush3.bf16.msra.mxu1 %v445_v6 }
   0xa   :  { %416 = vmatprep.subr.bf16.mxu1 %v446_v7 }
   0xb   :  { %401 = vmatpush3.bf16.msra.mxu0 %v438_v2 }
   0xc   :  { %402 = vmatprep.subr.bf16.mxu0 %v439_v4 }
   0xd   :  { %417 = vmatpush3.bf16.msra.mxu1 %v446_v7 }
   0xe   :  { %418 = vmatprep.subr.bf16.mxu1 %v447_v10 }
   0xf   :  { %403 = vmatpush3.bf16.msra.mxu0 %v439_v4 }
  0x11   :  { %419 = vmatpush3.bf16.msra.mxu1 %v447_v10 }
  0x12   :  { %405 = vmatmul.mubr.msk.bf16.vlgmr.msra.gmra.mxu0 %vm98_vm0, %v441_v8  ;;  %420 = vmatprep.subr.bf16.mxu1 %v448_v11 }
  0x13   :  { %408 = vmatprep.mubr.msk.bf16.mxu0 %vm98_vm0, %v442_v9 }
  0x15   :  { %421 = vmatpush3.bf16.msra.mxu1 %v448_v11 }
  0x16   :  { %422 = vmatprep.subr.bf16.mxu1 %v449_v13 }
  0x19   :  { %423 = vmatpush3.bf16.msra.mxu1 %v449_v13 }
  0x1a   :  { %409 = vmatmul.mubr.msk.bf16.gmra.mxu0 %vm98_vm0, %v443_v12  ;;  %424 = vmatprep.subr.bf16.mxu1 %v450_v14 }
  0x1d   :  { %425 = vmatpush3.bf16.msra.mxu1 %v450_v14 }
  0x1e   :  { %426 = vmatprep.subr.bf16.mxu1 %v451_v15 }
  0x21   :  { %427 = vmatpush3.bf16.msra.mxu1 %v451_v15 }
  0xd2   :  { %v406_v16 = vpop.f32.mrf.mxu0 }
  0xd4   :  { %v145_v17 = vpop.f32.mrf.mxu0 }
  0xd6   :  { %v407_v18 = vpop.f32.mrf.mxu0 }
  0xd7   :  { %v204_v21 = vpack.c.bf16 %v407_v18, %v406_v16 }
  0xd8   :  { %v148_v19 = vpop.f32.mrf.mxu0 }
  0xd9   :  { %v203_v20 = vpack.c.bf16 %v148_v19, %v145_v17 }
  0xda   :  { %v410_v22 = vpop.f32.mrf.mxu0 }
  0xdb   :  { %428 = vmatprep.mubr.bf16.mxu1 %v203_v20 }
  0xdc   :  { %v161_v23 = vpop.f32.mrf.mxu0  ;;  %429 = vmatmul.mubr.bf16.vlgmr.msra.gmra.mxu1 %v204_v21 }
  0xde   :  { %v411_v24 = vpop.f32.mrf.mxu0 }
  0xdf   :  { %v206_v27 = vpack.c.bf16 %v411_v24, %v410_v22 }
  0xe0   :  { %v164_v25 = vpop.f32.mrf.mxu0 }
  0xe1   :  { %v205_v26 = vpack.c.bf16 %v164_v25, %v161_v23 }
  0xe3   :  { %432 = vmatprep.mubr.bf16.mxu1 %v205_v26 }
  0xe4   :  { %433 = vmatmul.mubr.bf16.gmra.mxu1 %v206_v27 }
 0x19c   :  { %v430_v29 = vpop.f32.mrf.mxu1 }
 0x19d   :  { %v321_v30 = vadd.f32 %v430_v29, %v367_v28 }
 0x19e   :  { %v312_v31 = vpop.f32.mrf.mxu1 }
 0x19f   :  { %345 = vst [vmem:[%s560_s4 + $0x10] sm:$0xff] %v321_v30  ;;  %v313_v32 = vadd.f32 %v367_v28, %v312_v31 }
 0x1a0   :  { %v431_v33 = vpop.f32.mrf.mxu1 }
 0x1a1   :  { %343 = vst [vmem:[%s560_s4] sm:$0xff] %v313_v32  ;;  %v324_v34 = vadd.f32 %v431_v33, %v367_v28 }
 0x1a2   :  { %v315_v35 = vpop.f32.mrf.mxu1 }
 0x1a3   :  { %346 = vst [vmem:[%s560_s4 + $0x18] sm:$0xff] %v324_v34  ;;  %v316_v36 = vadd.f32 %v367_v28, %v315_v35 }
 0x1a4   :  { %v434_v37 = vpop.f32.mrf.mxu1 }
 0x1a5   :  { %344 = vst [vmem:[%s560_s4 + $0x8] sm:$0xff] %v316_v36  ;;  %v337_v38 = vadd.f32 %v434_v37, %v367_v28 }
 0x1a6   :  { %v328_v39 = vpop.f32.mrf.mxu1 }
 0x1a7   :  { %349 = vst [vmem:[%s560_s4 + $0x30] sm:$0xff] %v337_v38  ;;  %v329_v40 = vadd.f32 %v367_v28, %v328_v39 }
 0x1a8   :  { %v435_v41 = vpop.f32.mrf.mxu1 }
 0x1a9   :  { %347 = vst [vmem:[%s560_s4 + $0x20] sm:$0xff] %v329_v40  ;;  %v340_v42 = vadd.f32 %v435_v41, %v367_v28 }
 0x1aa   :  { %v331_v43 = vpop.f32.mrf.mxu1 }
 0x1ab   :  { %350 = vst [vmem:[%s560_s4 + $0x38] sm:$0xff] %v340_v42  ;;  %v332_v44 = vadd.f32 %v367_v28, %v331_v43 }
 0x1ad   :  { %348 = vst [vmem:[%s560_s4 + $0x28] sm:$0xff] %v332_v44 }

// kernel: gcn_clusternet_forward.5
= control target key start
LH: loop header
LB: loop body
LE: loop exit
PB: predicated region body
PF: predicated region fallthrough
CT: control target
= control target key end

     0   :  { %vm349_vm1 = vcmask 523264   ;;  %s4738_s0 = inlined_call_operand.vmem [shape: f32[64,128], index: 0, kind: input, shape index: {}]   ;;  %s4739_s1 = inlined_call_operand.vmem [shape: f32[128,128], index: 1, kind: input, shape index: {}]   ;;  %s4740_s2 = inlined_call_operand.vmem [shape: f32[128,128], index: 2, kind: output, shape index: {0}]   ;;  %s4741_s4 = inlined_call_operand.vmem [shape: f32[64,128], index: 4, kind: output, shape index: {2}]   ;;  %s4742_s3 = inlined_call_operand.vmem [shape: f32[64,128], index: 3, kind: output, shape index: {1}]  }
   0x1   :  { %v4138_v0 = vld [vmem:[%s4738_s0 + $0x10] sm:$0xff]  ;;  %v4143_v1 = vld [vmem:[%s4738_s0] sm:$0xff]  ;;  %v4148_v2 = vld [vmem:[%s4738_s0 + $0x18] sm:$0xff] }
   0x2   :  { %v24_v3 = vmul.f32 %v4138_v0, %v4138_v0  ;;  %v22_v4 = vmul.f32 %v4143_v1, %v4143_v1  ;;  %v4157_v5 = vld [vmem:[%s4738_s0 + $0x8] sm:$0xff]  ;;  %v113_v6 = vld [vmem:[%s4739_s1 + $0x78] sm:$0xff]  ;;  %v25_v7 = vmul.f32 %v4148_v2, %v4148_v2  ;;  %v112_v10 = vld [vmem:[%s4739_s1 + $0x70] sm:$0xff] }
   0x3   :  { %v23_v8 = vmul.f32 %v4157_v5, %v4157_v5  ;;  %v129_v9 = vmul.f32 30.0, %v113_v6  ;;  %v4172_v11 = vld [vmem:[%s4738_s0 + $0x28] sm:$0xff]  ;;  %v4177_v12 = vld [vmem:[%s4738_s0 + $0x20] sm:$0xff]  ;;  %v128_v13 = vmul.f32 30.0, %v112_v10  ;;  %v4189_v17 = vld [vmem:[%s4738_s0 + $0x38] sm:$0xff] }
   0x4   :  { %34 = vadd.xlane.f32.xlu1 %v24_v3  ;;  %30 = vadd.xlane.f32.xlu0 %v22_v4  ;;  %v111_v14 = vld [vmem:[%s4739_s1 + $0x68] sm:$0xff]  ;;  %v27_v15 = vmul.f32 %v4172_v11, %v4172_v11  ;;  %v26_v16 = vmul.f32 %v4177_v12, %v4177_v12  ;;  %v4194_v18 = vld [vmem:[%s4738_s0 + $0x30] sm:$0xff]  ;;  %v110_v20 = vld [vmem:[%s4739_s1 + $0x60] sm:$0xff]  ;;  %v29_v21 = vmul.f32 %v4189_v17, %v4189_v17 }
   0x5   :  { %3498 = vmatprep.subr.mxu0 %v129_v9  ;;  %v127_v19 = vmul.f32 30.0, %v111_v14  ;;  %v28_v22 = vmul.f32 %v4194_v18, %v4194_v18  ;;  %v126_v23 = vmul.f32 30.0, %v110_v20  ;;  %v109_v24 = vld [vmem:[%s4739_s1 + $0x58] sm:$0xff]  ;;  %v108_v26 = vld [vmem:[%s4739_s1 + $0x50] sm:$0xff]  ;;  %v107_v28 = vld [vmem:[%s4739_s1 + $0x48] sm:$0xff] }
   0x6   :  { %3499 = vmatpush3.xpose.msra.mxu0 %v129_v9  ;;  %v125_v25 = vmul.f32 30.0, %v109_v24  ;;  %v124_v27 = vmul.f32 30.0, %v108_v26  ;;  %v123_v29 = vmul.f32 30.0, %v107_v28  ;;  %v106_v30 = vld [vmem:[%s4739_s1 + $0x40] sm:$0xff]  ;;  %v105_v32 = vld [vmem:[%s4739_s1 + $0x38] sm:$0xff]  ;;  %v104_v34 = vld [vmem:[%s4739_s1 + $0x30] sm:$0xff] }
   0x7   :  { %3500 = vmatprep.subr.mxu0 %v128_v13  ;;  %v122_v31 = vmul.f32 30.0, %v106_v30  ;;  %v121_v33 = vmul.f32 30.0, %v105_v32  ;;  %v120_v35 = vmul.f32 30.0, %v104_v34  ;;  %v103_v36 = vld [vmem:[%s4739_s1 + $0x28] sm:$0xff]  ;;  %v102_v38 = vld [vmem:[%s4739_s1 + $0x20] sm:$0xff]  ;;  %v101_v40 = vld [vmem:[%s4739_s1 + $0x18] sm:$0xff] }
   0x8   :  { %36 = vadd.xlane.f32.xlu1 %v25_v7  ;;  %32 = vadd.xlane.f32.xlu0 %v23_v8  ;;  %v119_v37 = vmul.f32 30.0, %v103_v36  ;;  %v118_v39 = vmul.f32 30.0, %v102_v38  ;;  %v117_v41 = vmul.f32 30.0, %v101_v40  ;;  %v100_v42 = vld [vmem:[%s4739_s1 + $0x10] sm:$0xff]  ;;  %v99_v44 = vld [vmem:[%s4739_s1 + $0x8] sm:$0xff]  ;;  %v98_v46 = vld [vmem:[%s4739_s1] sm:$0xff]  ;;  %v62_v8 = vlaneseq }
   0x9   :  { %v116_v43 = vmul.f32 30.0, %v100_v42  ;;  %v115_v45 = vmul.f32 30.0, %v99_v44  ;;  %v114_v47 = vmul.f32 30.0, %v98_v46 }
   0xa   :  { %3501 = vmatpush3.xpose.msra.mxu0 %v128_v13  ;;  %v4288_v9 = vand.u32 127, %v62_v8 }
   0xb   :  { %3502 = vmatprep.subr.mxu0 %v127_v19 }
   0xc   :  { %40 = vadd.xlane.f32.xlu1 %v27_v15  ;;  %38 = vadd.xlane.f32.xlu0 %v26_v16  ;;  %vm64_vm0 = vcmp.lt.s32.totalorder %v4288_v9, 8 }
   0xe   :  { %3503 = vmatpush3.xpose.msra.mxu0 %v127_v19 }
   0xf   :  { %3504 = vmatprep.subr.mxu0 %v126_v23 }
  0x10   :  { %44 = vadd.xlane.f32.xlu1 %v29_v21  ;;  %42 = vadd.xlane.f32.xlu0 %v28_v22 }
  0x12   :  { %3505 = vmatpush3.xpose.msra.mxu0 %v126_v23 }
  0x13   :  { %3506 = vmatprep.subr.mxu0 %v125_v25 }
  0x16   :  { %3507 = vmatpush3.xpose.msra.mxu0 %v125_v25 }
  0x17   :  { %3508 = vmatprep.subr.mxu0 %v124_v27 }
  0x1a   :  { %3509 = vmatpush3.xpose.msra.mxu0 %v124_v27 }
  0x1b   :  { %3510 = vmatprep.subr.mxu0 %v123_v29 }
  0x1e   :  { %3511 = vmatpush3.xpose.msra.mxu0 %v123_v29 }
  0x1f   :  { %3512 = vmatprep.subr.mxu0 %v122_v31 }
  0x22   :  { %3513 = vmatpush3.xpose.msra.mxu0 %v122_v31 }
  0x23   :  { %3514 = vmatprep.subr.mxu0 %v121_v33 }
  0x26   :  { %3515 = vmatpush3.xpose.msra.mxu0 %v121_v33 }
  0x27   :  { %3516 = vmatprep.subr.mxu0 %v120_v35 }
  0x2a   :  { %3517 = vmatpush3.xpose.msra.mxu0 %v120_v35 }
  0x2b   :  { %3518 = vmatprep.subr.mxu0 %v119_v37 }
  0x2e   :  { %3519 = vmatpush3.xpose.msra.mxu0 %v119_v37 }
  0x2f   :  { %3520 = vmatprep.subr.mxu0 %v118_v39 }
  0x32   :  { %3521 = vmatpush3.xpose.msra.mxu0 %v118_v39 }
  0x33   :  { %3522 = vmatprep.subr.mxu0 %v117_v41 }
  0x36   :  { %3523 = vmatpush3.xpose.msra.mxu0 %v117_v41 }
  0x37   :  { %3524 = vmatprep.subr.mxu0 %v116_v43 }
  0x3a   :  { %3525 = vmatpush3.xpose.msra.mxu0 %v116_v43 }
  0x3b   :  { %3526 = vmatprep.subr.mxu0 %v115_v45 }
  0x3e   :  { %3527 = vmatpush3.xpose.msra.mxu0 %v115_v45 }
  0x3f   :  { %3528 = vmatprep.subr.mxu0 %v114_v47 }
  0x42   :  { %3529 = vmatpush3.xpose.msra.mxu0 %v114_v47 }
  0x8d   :  { %v35_v48 = vpop.xlane.xlu1 %34  ;;  %v31_v49 = vpop.xlane.xlu0 %30 }
  0x8e   :  { %3923 = vrsqrt.f32 %v31_v49 }
  0x8f   :  { %3925 = vrsqrt.f32 %v35_v48 }
  0x91   :  { %v37_v50 = vpop.xlane.xlu1 %36  ;;  %v33_v51 = vpop.xlane.xlu0 %32 }
  0x92   :  { %3927 = vrsqrt.f32 %v37_v50 }
  0x93   :  { %3929 = vrsqrt.f32 %v33_v51 }
  0x95   :  { %v41_v52 = vpop.xlane.xlu1 %40  ;;  %v39_v53 = vpop.xlane.xlu0 %38 }
  0x96   :  { %3931 = vrsqrt.f32 %v41_v52 }
  0x97   :  { %3933 = vrsqrt.f32 %v39_v53 }
  0x99   :  { %v45_v54 = vpop.xlane.xlu1 %44  ;;  %v43_v55 = vpop.xlane.xlu0 %42 }
  0x9a   :  { %3935 = vrsqrt.f32 %v45_v54 }
  0x9b   :  { %3937 = vrsqrt.f32 %v43_v55  ;;  %v3924_v56 = vpop.eup %3923 }
  0x9c   :  { %v3926_v57 = vpop.eup %3925  ;;  %v4240_v58 = vmul.f32 %v3924_v56, %v4143_v1 }
  0x9d   :  { %v4244_v61 = vmul.f32 %v3926_v57, %v4138_v0 }
  0x9e   :  { %3530 = vmatprep.mubr.f32.mxu0 %v4240_v58 }
  0x9f   :  { %v3928_v59 = vpop.eup %3927 }
  0xa0   :  { %v3930_v60 = vpop.eup %3929  ;;  %v4250_v3 = vmul.f32 %v3928_v59, %v4148_v2 }
  0xa1   :  { %v4247_v62 = vmul.f32 %v3930_v60, %v4157_v5 }
  0xa3   :  { %v3932_v63 = vpop.eup %3931  ;;  %3531 = vmatmul.mubr.f32.vlgmr.msra.gmra.mxu0 %v4247_v62 }
  0xa4   :  { %v3934_v4 = vpop.eup %3933  ;;  %3533 = vmatprep.mubr.f32.mxu0 %v4244_v61  ;;  %v4258_v7 = vmul.f32 %v3932_v63, %v4172_v11 }
  0xa5   :  { %v4255_v1 = vmul.f32 %v3934_v4, %v4177_v12 }
  0xa7   :  { %v3936_v6 = vpop.eup %3935  ;;  %3534 = vmatmul.mubr.f32.gmra.mxu0 %v4250_v3 }
  0xa8   :  { %v3938_v0 = vpop.eup %3937  ;;  %v4262_v5 = vmul.f32 %v3936_v6, %v4189_v17  ;;  %3536 = vmatprep.mubr.f32.mxu0 %v4255_v1 }
  0xa9   :  { %v4266_v2 = vmul.f32 %v3938_v0, %v4194_v18 }
  0xaa   :  { %3542 = vmatprep.subr.mxu1 %v4262_v5 }
  0xab   :  { %3537 = vmatmul.mubr.f32.gmra.mxu0 %v4258_v7  ;;  %3543 = vmatpush3.msra.mxu1 %v4262_v5 }
  0xac   :  { %3544 = vmatprep.subr.mxu1 %v4266_v2  ;;  %3539 = vmatprep.mubr.f32.mxu0 %v4266_v2 }
  0xad   :  { %3545 = vmatpush3.msra.mxu1 %v4266_v2 }
  0xae   :  { %3546 = vmatprep.subr.mxu1 %v4258_v7 }
  0xaf   :  { %3540 = vmatmul.mubr.f32.gmra.mxu0 %v4262_v5  ;;  %3547 = vmatpush3.msra.mxu1 %v4258_v7 }
  0xb0   :  { %3624 = vmatprep.mubr.f32.mxu0 %v4240_v58  ;;  %3548 = vmatprep.subr.mxu1 %v4255_v1 }
  0xb1   :  { %3549 = vmatpush3.msra.mxu1 %v4255_v1 }
  0xb2   :  { %3550 = vmatprep.subr.mxu1 %v4250_v3 }
  0xb3   :  { %3551 = vmatpush3.msra.mxu1 %v4250_v3 }
  0xb4   :  { %3552 = vmatprep.subr.mxu1 %v4244_v61 }
  0xb5   :  { %3553 = vmatpush3.msra.mxu1 %v4244_v61 }
  0xb6   :  { %3554 = vmatprep.subr.mxu1 %v4247_v62 }
  0xb7   :  { %3555 = vmatpush3.msra.mxu1 %v4247_v62 }
  0xb8   :  { %3556 = vmatprep.subr.mxu1 %v4240_v58 }
  0xb9   :  { %3557 = vmatpush3.msra.mxu1 %v4240_v58 }
 0x163   :  { %v3532_v10 = vpop.f32.mrf.mxu0 }
 0x164   :  { %v238_v11 = vsel %vm64_vm0, %v3532_v10, -1e+30  ;;  %v4107_v10 = vmov 1.0  }
 0x165   :  { %247 = vmax.xlane.f32.xlu1 %v238_v11  ;;  %v196_v12 = vpop.f32.mrf.mxu0  ;;  %3582 = vmatprep.subr.mxu1 %v4107_v10 }
 0x166   :  { %v237_v13 = vsel %vm64_vm0, %v196_v12, -1e+30 }
 0x167   :  { %245 = vmax.xlane.f32.xlu0 %v237_v13  ;;  %v3535_v14 = vpop.f32.mrf.mxu0 }
 0x168   :  { %v240_v15 = vsel %vm64_vm0, %v3535_v14, -1e+30 }
 0x169   :  { %251 = vmax.xlane.f32.xlu1 %v240_v15  ;;  %v206_v16 = vpop.f32.mrf.mxu0 }
 0x16a   :  { %v239_v17 = vsel %vm64_vm0, %v206_v16, -1e+30 }
 0x16b   :  { %249 = vmax.xlane.f32.xlu0 %v239_v17  ;;  %v3538_v18 = vpop.f32.mrf.mxu0 }
 0x16c   :  { %v242_v19 = vsel %vm64_vm0, %v3538_v18, -1e+30 }
 0x16d   :  { %255 = vmax.xlane.f32.xlu1 %v242_v19  ;;  %v216_v20 = vpop.f32.mrf.mxu0 }
 0x16e   :  { %v241_v21 = vsel %vm64_vm0, %v216_v20, -1e+30 }
 0x16f   :  { %253 = vmax.xlane.f32.xlu0 %v241_v21  ;;  %v3541_v22 = vpop.f32.mrf.mxu0 }
 0x170   :  { %v244_v23 = vsel %vm64_vm0, %v3541_v22, -1e+30 }
 0x171   :  { %259 = vmax.xlane.f32.xlu1 %v244_v23  ;;  %v226_v24 = vpop.f32.mrf.mxu0 }
 0x172   :  { %v243_v25 = vsel %vm64_vm0, %v226_v24, -1e+30 }
 0x173   :  { %257 = vmax.xlane.f32.xlu0 %v243_v25 }
 0x1ee   :  { %v248_v26 = vpop.xlane.xlu1 %247 }
 0x1ef   :  { %v262_v27 = vsub.f32 %v238_v11, %v248_v26 }
 0x1f0   :  { %v246_v28 = vpop.xlane.xlu0 %245 }
 0x1f1   :  { %v271_v29 = vmul.f32 1.442695, %v262_v27  ;;  %v261_v30 = vsub.f32 %v237_v13, %v246_v28 }
 0x1f2   :  { %v252_v31 = vpop.xlane.xlu1 %251 }
 0x1f3   :  { %3939 = vpow2.f32 %v271_v29  ;;  %v269_v32 = vmul.f32 1.442695, %v261_v30  ;;  %v264_v33 = vsub.f32 %v240_v15, %v252_v31 }
 0x1f4   :  { %v250_v34 = vpop.xlane.xlu0 %249 }
 0x1f5   :  { %3941 = vpow2.f32 %v269_v32  ;;  %v275_v35 = vmul.f32 1.442695, %v264_v33  ;;  %v263_v36 = vsub.f32 %v239_v17, %v250_v34 }
 0x1f6   :  { %v256_v37 = vpop.xlane.xlu1 %255 }
 0x1f7   :  { %3943 = vpow2.f32 %v275_v35  ;;  %v273_v38 = vmul.f32 1.442695, %v263_v36  ;;  %v266_v39 = vsub.f32 %v242_v19, %v256_v37 }
 0x1f8   :  { %v254_v40 = vpop.xlane.xlu0 %253 }
 0x1f9   :  { %3945 = vpow2.f32 %v273_v38  ;;  %v279_v41 = vmul.f32 1.442695, %v266_v39  ;;  %v265_v42 = vsub.f32 %v241_v21, %v254_v40 }
 0x1fa   :  { %v260_v43 = vpop.xlane.xlu1 %259 }
 0x1fb   :  { %3947 = vpow2.f32 %v279_v41  ;;  %v277_v44 = vmul.f32 1.442695, %v265_v42  ;;  %v268_v45 = vsub.f32 %v244_v23, %v260_v43 }
 0x1fc   :  { %v258_v46 = vpop.xlane.xlu0 %257 }
 0x1fd   :  { %3949 = vpow2.f32 %v277_v44  ;;  %v283_v47 = vmul.f32 1.442695, %v268_v45  ;;  %v267_v48 = vsub.f32 %v243_v25, %v258_v46  ;;  %v4108_v44 = vmov 0  }
 0x1fe   :  { %3921 = vset.pattern.permute.xlu1 %v4108_v44 }
 0x1ff   :  { %3951 = vpow2.f32 %v283_v47  ;;  %v281_v49 = vmul.f32 1.442695, %v267_v48 }
 0x200   :  { %v3940_v50 = vpop.eup %3939 }
 0x201   :  { %3953 = vpow2.f32 %v281_v49  ;;  %287 = vadd.xlane.f32.xlu1 %v3940_v50 }
 0x202   :  { %v3942_v51 = vpop.eup %3941 }
 0x203   :  { %285 = vadd.xlane.f32.xlu0 %v3942_v51 }
 0x204   :  { %v3944_v52 = vpop.eup %3943 }
 0x205   :  { %291 = vadd.xlane.f32.xlu1 %v3944_v52 }
 0x206   :  { %v3946_v53 = vpop.eup %3945 }
 0x207   :  { %289 = vadd.xlane.f32.xlu0 %v3946_v53 }
 0x208   :  { %v3948_v54 = vpop.eup %3947 }
 0x209   :  { %295 = vadd.xlane.f32.xlu1 %v3948_v54 }
 0x20a   :  { %v3950_v55 = vpop.eup %3949 }
 0x20b   :  { %293 = vadd.xlane.f32.xlu0 %v3950_v55 }
 0x20c   :  { %v3952_v56 = vpop.eup %3951 }
 0x20d   :  { %299 = vadd.xlane.f32.xlu1 %v3952_v56 }
 0x20e   :  { %v3954_v57 = vpop.eup %3953 }
 0x20f   :  { %297 = vadd.xlane.f32.xlu0 %v3954_v57 }
 0x28a   :  { %v288_v59 = vpop.xlane.xlu1 %287 }
 0x28c   :  { %v286_v60 = vpop.xlane.xlu0 %285 }
 0x28d   :  { %3955 = vrcp.f32 %v286_v60 }
 0x28e   :  { %3957 = vrcp.f32 %v288_v59  ;;  %v292_v4 = vpop.xlane.xlu1 %291 }
 0x290   :  { %v290_v63 = vpop.xlane.xlu0 %289 }
 0x291   :  { %3959 = vrcp.f32 %v290_v63 }
 0x292   :  { %3961 = vrcp.f32 %v292_v4  ;;  %v296_v12 = vpop.xlane.xlu1 %295 }
 0x294   :  { %v294_v6 = vpop.xlane.xlu0 %293 }
 0x295   :  { %3963 = vrcp.f32 %v294_v6 }
 0x296   :  { %3965 = vrcp.f32 %v296_v12  ;;  %v300_v18 = vpop.xlane.xlu1 %299 }
 0x298   :  { %v298_v15 = vpop.xlane.xlu0 %297 }
 0x299   :  { %3967 = vrcp.f32 %v298_v15 }
 0x29a   :  { %v3956_v0 = vpop.eup %3955  ;;  %3969 = vrcp.f32 %v300_v18 }
 0x29b   :  { %v309_v8 = vmul.f32 %v3956_v0, %v3942_v51  ;;  %v3958_v11 = vpop.eup %3957 }
 0x29c   :  { %v310_v13 = vmul.f32 %v3958_v11, %v3940_v50 }
 0x29d   :  { %317 = vxpose.xlu0.b32.start [1/8] (short) %v309_v8, 128 }
 0x29e   :  { %v3960_v14 = vpop.eup %3959 }
 0x29f   :  { %v311_v16 = vmul.f32 %v3960_v14, %v3946_v53  ;;  %v3962_v17 = vpop.eup %3961 }
 0x2a0   :  { %v312_v19 = vmul.f32 %v3962_v17, %v3944_v52 }
 0x2a1   :  { %318 = vxpose.xlu0.b32.cont [2/8] (short) %v310_v13, 128 }
 0x2a2   :  { %v3964_v20 = vpop.eup %3963 }
 0x2a3   :  { %v313_v21 = vmul.f32 %v3964_v20, %v3950_v55  ;;  %v3966_v22 = vpop.eup %3965 }
 0x2a4   :  { %v314_v23 = vmul.f32 %v3966_v22, %v3948_v54 }
 0x2a5   :  { %319 = vxpose.xlu0.b32.cont [3/8] (short) %v311_v16, 128 }
 0x2a6   :  { %v3968_v24 = vpop.eup %3967 }
 0x2a7   :  { %v315_v25 = vmul.f32 %v3968_v24, %v3954_v57  ;;  %v3970_v26 = vpop.eup %3969 }
 0x2a8   :  { %v316_v27 = vmul.f32 %v3970_v26, %v3952_v56 }
 0x2a9   :  { %320 = vxpose.xlu0.b32.cont [4/8] (short) %v312_v19, 128 }
 0x2ad   :  { %321 = vxpose.xlu0.b32.cont [5/8] (short) %v313_v21, 128 }
 0x2b1   :  { %322 = vxpose.xlu0.b32.cont [6/8] (short) %v314_v23, 128 }
 0x2b5   :  { %323 = vxpose.xlu0.b32.cont [7/8] (short) %v315_v25, 128 }
 0x2b9   :  { %324 = vxpose.xlu0.b32.end [8/8] (short) %v316_v27, 128 }
 0x2e2   :  { %3922 = vset.pattern.permute.xlu0 %v4108_v44 }
 0x319   :  { %v333_v28 = vpop.trf.xlu0 }
 0x31a   :  { %3558 = vmatprep.mubr.msk.f32.mxu1 %vm349_vm1, %v333_v28 }
 0x31d   :  { %v334_v29 = vpop.trf.xlu0 }
 0x31e   :  { %3559 = vmatmul.mubr.msk.f32.vlgmr.msra.gmra.mxu1 %vm349_vm1, %v334_v29 }
 0x31f   :  { %3583 = vmatpush3.msra.mxu1 %v4107_v10 }
 0x320   :  { %3584 = vmatprep.subr.mxu1 %v4107_v10 }
 0x321   :  { %3585 = vmatpush3.msra.mxu1 %v4107_v10  ;;  %v335_v30 = vpop.trf.xlu0 }
 0x322   :  { %3586 = vmatprep.subr.mxu1 %v4107_v10  ;;  %3561 = vmatprep.mubr.msk.f32.mxu1 %vm349_vm1, %v335_v30 }
 0x323   :  { %3587 = vmatpush3.msra.mxu1 %v4107_v10 }
 0x324   :  { %3588 = vmatprep.subr.mxu1 %v4107_v10 }
 0x325   :  { %3589 = vmatpush3.msra.mxu1 %v4107_v10  ;;  %v336_v31 = vpop.trf.xlu0 }
 0x326   :  { %3590 = vmatprep.subr.mxu1 %v4107_v10  ;;  %3562 = vmatmul.mubr.msk.f32.gmra.mxu1 %vm349_vm1, %v336_v31 }
 0x327   :  { %3591 = vmatpush3.msra.mxu1 %v4107_v10 }
 0x328   :  { %3592 = vmatprep.subr.mxu1 %v4107_v10 }
 0x329   :  { %3593 = vmatpush3.msra.mxu1 %v4107_v10  ;;  %v337_v32 = vpop.trf.xlu0 }
 0x32a   :  { %3594 = vmatprep.subr.mxu1 %v4107_v10  ;;  %3564 = vmatprep.mubr.msk.f32.mxu1 %vm349_vm1, %v337_v32 }
 0x32b   :  { %3595 = vmatpush3.msra.mxu1 %v4107_v10 }
 0x32c   :  { %3596 = vmatprep.subr.mxu1 %v4107_v10 }
 0x32d   :  { %3597 = vmatpush3.msra.mxu1 %v4107_v10  ;;  %v338_v33 = vpop.trf.xlu0 }
 0x32e   :  { %3636 = vmatprep.subr.mxu1 %v4262_v5  ;;  %3565 = vmatmul.mubr.msk.f32.gmra.mxu1 %vm349_vm1, %v338_v33 }
 0x331   :  { %v339_v34 = vpop.trf.xlu0 }
 0x332   :  { %3567 = vmatprep.mubr.msk.f32.mxu1 %vm349_vm1, %v339_v34 }
 0x335   :  { %v340_v35 = vpop.trf.xlu0 }
 0x336   :  { %3568 = vmatmul.mubr.msk.f32.gmra.mxu1 %vm349_vm1, %v340_v35 }
 0x339   :  { %v341_v36 = vpop.trf.xlu0 }
 0x33a   :  { %3570 = vmatprep.mubr.msk.f32.mxu1 %vm349_vm1, %v341_v36 }
 0x33d   :  { %v342_v37 = vpop.trf.xlu0 }
 0x33e   :  { %3571 = vmatmul.mubr.msk.f32.gmra.mxu1 %vm349_vm1, %v342_v37 }
 0x341   :  { %v343_v38 = vpop.trf.xlu0 }
 0x342   :  { %3573 = vmatprep.mubr.msk.f32.mxu1 %vm349_vm1, %v343_v38 }
 0x345   :  { %v344_v39 = vpop.trf.xlu0 }
 0x346   :  { %3574 = vmatmul.mubr.msk.f32.gmra.mxu1 %vm349_vm1, %v344_v39 }
 0x349   :  { %v345_v40 = vpop.trf.xlu0 }
 0x34a   :  { %3576 = vmatprep.mubr.msk.f32.mxu1 %vm349_vm1, %v345_v40 }
 0x34d   :  { %v346_v41 = vpop.trf.xlu0 }
 0x34e   :  { %3577 = vmatmul.mubr.msk.f32.gmra.mxu1 %vm349_vm1, %v346_v41 }
 0x351   :  { %v347_v42 = vpop.trf.xlu0 }
 0x352   :  { %3579 = vmatprep.mubr.msk.f32.mxu1 %vm349_vm1, %v347_v42 }
 0x355   :  { %v348_v43 = vpop.trf.xlu0 }
 0x356   :  { %3580 = vmatmul.mubr.msk.f32.gmra.mxu1 %vm349_vm1, %v348_v43 }
 0x357   :  { %3598 = vmatprep.mubr.msk.f32.mxu1 %vm349_vm1, %v333_v28 }
 0x35a   :  { %3599 = vmatmul.mubr.msk.f32.vlgmr.msra.gmra.mxu1 %vm349_vm1, %v334_v29 }
 0x35b   :  { %3637 = vmatpush3.msra.mxu1 %v4262_v5  ;;  %3601 = vmatprep.mubr.msk.f32.mxu1 %vm349_vm1, %v335_v30 }
 0x35c   :  { %3638 = vmatprep.subr.mxu1 %v4266_v2 }
 0x35d   :  { %3639 = vmatpush3.msra.mxu1 %v4266_v2 }
 0x35e   :  { %3640 = vmatprep.subr.mxu1 %v4258_v7  ;;  %3602 = vmatmul.mubr.msk.f32.gmra.mxu1 %vm349_vm1, %v336_v31 }
 0x35f   :  { %3641 = vmatpush3.msra.mxu1 %v4258_v7  ;;  %3604 = vmatprep.mubr.msk.f32.mxu1 %vm349_vm1, %v337_v32 }
 0x360   :  { %3642 = vmatprep.subr.mxu1 %v4255_v1 }
 0x361   :  { %3643 = vmatpush3.msra.mxu1 %v4255_v1 }
 0x362   :  { %3644 = vmatprep.subr.mxu1 %v4250_v3  ;;  %3605 = vmatmul.mubr.msk.f32.gmra.mxu1 %vm349_vm1, %v338_v33 }
 0x363   :  { %3645 = vmatpush3.msra.mxu1 %v4250_v3  ;;  %3607 = vmatprep.mubr.msk.f32.mxu1 %vm349_vm1, %v339_v34 }
 0x364   :  { %3646 = vmatprep.subr.mxu1 %v4244_v61 }
 0x365   :  { %3647 = vmatpush3.msra.mxu1 %v4244_v61 }
 0x366   :  { %3648 = vmatprep.subr.mxu1 %v4247_v62  ;;  %3608 = vmatmul.mubr.msk.f32.gmra.mxu1 %vm349_vm1, %v340_v35 }
 0x367   :  { %3649 = vmatpush3.msra.mxu1 %v4247_v62  ;;  %3610 = vmatprep.mubr.msk.f32.mxu1 %vm349_vm1, %v341_v36 }
 0x368   :  { %3650 = vmatprep.subr.mxu1 %v4240_v58 }
 0x369   :  { %3651 = vmatpush3.msra.mxu1 %v4240_v58 }
 0x36a   :  { %3611 = vmatmul.mubr.msk.f32.gmra.mxu1 %vm349_vm1, %v342_v37 }
 0x36b   :  { %3613 = vmatprep.mubr.msk.f32.mxu1 %vm349_vm1, %v343_v38 }
 0x36e   :  { %3614 = vmatmul.mubr.msk.f32.gmra.mxu1 %vm349_vm1, %v344_v39 }
 0x36f   :  { %3616 = vmatprep.mubr.msk.f32.mxu1 %vm349_vm1, %v345_v40 }
 0x372   :  { %3617 = vmatmul.mubr.msk.f32.gmra.mxu1 %vm349_vm1, %v346_v41 }
 0x373   :  { %3619 = vmatprep.mubr.msk.f32.mxu1 %vm349_vm1, %v347_v42 }
 0x376   :  { %3620 = vmatmul.mubr.msk.f32.gmra.mxu1 %vm349_vm1, %v348_v43 }
 0x3de   :  { %v3560_v45 = vpop.f32.mrf.mxu1 }
 0x3e0   :  { %v464_v46 = vpop.f32.mrf.mxu1 }
 0x3e6   :  { %v3563_v47 = vpop.f32.mrf.mxu1 }
 0x3e8   :  { %v474_v48 = vpop.f32.mrf.mxu1 }
 0x3ee   :  { %v3566_v49 = vpop.f32.mrf.mxu1 }
 0x3f0   :  { %v484_v50 = vpop.f32.mrf.mxu1 }
 0x3f6   :  { %v3569_v51 = vpop.f32.mrf.mxu1 }
 0x3f8   :  { %v494_v52 = vpop.f32.mrf.mxu1 }
 0x3fe   :  { %v3572_v53 = vpop.f32.mrf.mxu1 }
 0x400   :  { %v504_v54 = vpop.f32.mrf.mxu1 }
 0x406   :  { %v3575_v55 = vpop.f32.mrf.mxu1 }
 0x408   :  { %v514_v56 = vpop.f32.mrf.mxu1 }
 0x40e   :  { %v3578_v57 = vpop.f32.mrf.mxu1 }
 0x410   :  { %v524_v59 = vpop.f32.mrf.mxu1 }
 0x416   :  { %v3581_v60 = vpop.f32.mrf.mxu1 }
 0x418   :  { %v534_v63 = vpop.f32.mrf.mxu1 }
 0x41a   :  { %v3600_v4 = vpop.f32.mrf.mxu1 }
 0x41c   :  { %v609_v6 = vpop.f32.mrf.mxu1 }
 0x41d   :  { %3971 = vrcp.f32 %v609_v6 }
 0x41e   :  { %v3603_v0 = vpop.f32.mrf.mxu1 }
 0x420   :  { %v619_v8 = vpop.f32.mrf.mxu1 }
 0x422   :  { %v3606_v11 = vpop.f32.mrf.mxu1 }
 0x424   :  { %v629_v12 = vpop.f32.mrf.mxu1 }
 0x426   :  { %v3609_v13 = vpop.f32.mrf.mxu1 }
 0x428   :  { %v639_v14 = vpop.f32.mrf.mxu1 }
 0x42a   :  { %v3972_v15 = vpop.eup %3971  ;;  %v3612_v16 = vpop.f32.mrf.mxu1 }
 0x42b   :  { %706 = vperm.xlu1 %3921, %v3972_v15  }
 0x42c   :  { %v649_v17 = vpop.f32.mrf.mxu1 }
 0x42e   :  { %v3615_v18 = vpop.f32.mrf.mxu1 }
 0x430   :  { %v659_v19 = vpop.f32.mrf.mxu1 }
 0x432   :  { %v3618_v20 = vpop.f32.mrf.mxu1 }
 0x434   :  { %v669_v21 = vpop.f32.mrf.mxu1 }
 0x436   :  { %v3621_v22 = vpop.f32.mrf.mxu1 }
 0x438   :  { %v679_v23 = vpop.f32.mrf.mxu1 }
 0x4a6   :  { %v707_v24 = vpop.permute.xlu1 %706 }
 0x4a7   :  { %v784_v25 = vmul.f32 %v707_v24, %v464_v46 }
 0x4a9   :  { %v848_v26 = vmul.f32 30.0, %v784_v25 }
 0x4ab   :  { %3622 = vmatprep.subr.mxu0 %v848_v26 }
 0x4ac   :  { %3623 = vmatpush3.xpose.msra.mxu0 %v848_v26 }
 0x4ad   :  { %3676 = vmatprep.subr.mxu0 %v4107_v10 }
 0x4af   :  { %3625 = vmatmul.mubr.f32.vlgmr.msra.gmra.mxu0 %v4247_v62 }
 0x4b0   :  { %3627 = vmatprep.mubr.f32.mxu0 %v4244_v61  ;;  %3677 = vmatpush3.msra.mxu0 %v4107_v10 }
 0x4b1   :  { %3678 = vmatprep.subr.mxu0 %v4107_v10 }
 0x4b2   :  { %3679 = vmatpush3.msra.mxu0 %v4107_v10 }
 0x4b3   :  { %3628 = vmatmul.mubr.f32.gmra.mxu0 %v4250_v3  ;;  %3680 = vmatprep.subr.mxu0 %v4107_v10 }
 0x4b4   :  { %3630 = vmatprep.mubr.f32.mxu0 %v4255_v1  ;;  %3681 = vmatpush3.msra.mxu0 %v4107_v10 }
 0x4b5   :  { %3682 = vmatprep.subr.mxu0 %v4107_v10 }
 0x4b6   :  { %3683 = vmatpush3.msra.mxu0 %v4107_v10 }
 0x4b7   :  { %3631 = vmatmul.mubr.f32.gmra.mxu0 %v4258_v7  ;;  %3684 = vmatprep.subr.mxu0 %v4107_v10 }
 0x4b8   :  { %3633 = vmatprep.mubr.f32.mxu0 %v4266_v2  ;;  %3685 = vmatpush3.msra.mxu0 %v4107_v10 }
 0x4b9   :  { %3686 = vmatprep.subr.mxu0 %v4107_v10 }
 0x4ba   :  { %3687 = vmatpush3.msra.mxu0 %v4107_v10 }
 0x4bb   :  { %3634 = vmatmul.mubr.f32.gmra.mxu0 %v4262_v5  ;;  %3688 = vmatprep.subr.mxu0 %v4107_v10 }
 0x4bc   :  { %3689 = vmatpush3.msra.mxu0 %v4107_v10 }
 0x4bd   :  { %3690 = vmatprep.subr.mxu0 %v4107_v10 }
 0x4be   :  { %3691 = vmatpush3.msra.mxu0 %v4107_v10 }
 0x4bf   :  { %3730 = vmatprep.subr.mxu0 %v4262_v5 }
 0x56f   :  { %v3626_v27 = vpop.f32.mrf.mxu0 }
 0x570   :  { %v970_v28 = vsel %vm64_vm0, %v3626_v27, -1e+30 }
 0x571   :  { %v979_v29 = vmul.f32 1.442695, %v970_v28  ;;  %v930_v30 = vpop.f32.mrf.mxu0 }
 0x572   :  { %v969_v31 = vsel %vm64_vm0, %v930_v30, -1e+30 }
 0x573   :  { %3973 = vpow2.f32 %v979_v29  ;;  %v977_v32 = vmul.f32 1.442695, %v969_v31  ;;  %v3629_v33 = vpop.f32.mrf.mxu0 }
 0x574   :  { %v972_v34 = vsel %vm64_vm0, %v3629_v33, -1e+30 }
 0x575   :  { %v940_v35 = vpop.f32.mrf.mxu0  ;;  %3975 = vpow2.f32 %v977_v32  ;;  %v983_v36 = vmul.f32 1.442695, %v972_v34 }
 0x576   :  { %v971_v38 = vsel %vm64_vm0, %v940_v35, -1e+30 }
 0x577   :  { %v3632_v37 = vpop.f32.mrf.mxu0  ;;  %3977 = vpow2.f32 %v983_v36  ;;  %v981_v40 = vmul.f32 1.442695, %v971_v38 }
 0x578   :  { %v974_v48 = vsel %vm64_vm0, %v3632_v37, -1e+30 }
 0x579   :  { %v950_v39 = vpop.f32.mrf.mxu0  ;;  %3979 = vpow2.f32 %v981_v40  ;;  %v987_v49 = vmul.f32 1.442695, %v974_v48 }
 0x57a   :  { %v973_v42 = vsel %vm64_vm0, %v950_v39, -1e+30 }
 0x57b   :  { %v3635_v41 = vpop.f32.mrf.mxu0  ;;  %v985_v45 = vmul.f32 1.442695, %v973_v42 }
 0x57c   :  { %v976_v51 = vsel %vm64_vm0, %v3635_v41, -1e+30 }
 0x57d   :  { %v960_v43 = vpop.f32.mrf.mxu0  ;;  %v991_v52 = vmul.f32 1.442695, %v976_v51 }
 0x57e   :  { %v975_v44 = vsel %vm64_vm0, %v960_v43, -1e+30 }
 0x57f   :  { %v989_v46 = vmul.f32 1.442695, %v975_v44 }
 0x580   :  { %v3974_v47 = vpop.eup %3973 }
 0x581   :  { %3981 = vpow2.f32 %v989_v46  ;;  %995 = vadd.xlane.f32.xlu1 %v3974_v47 }
 0x582   :  { %3983 = vpow2.f32 %v985_v45  ;;  %v3976_v50 = vpop.eup %3975 }
 0x583   :  { %3985 = vpow2.f32 %v987_v49 }
 0x584   :  { %v3978_v53 = vpop.eup %3977  ;;  %3987 = vpow2.f32 %v991_v52 }
 0x585   :  { %993 = vadd.xlane.f32.xlu1 %v3976_v50 }
 0x586   :  { %v3980_v54 = vpop.eup %3979 }
 0x589   :  { %999 = vadd.xlane.f32.xlu1 %v3978_v53 }
 0x58d   :  { %997 = vadd.xlane.f32.xlu1 %v3980_v54 }
 0x58e   :  { %v3982_v55 = vpop.eup %3981 }
 0x58f   :  { %1005 = vadd.xlane.f32.xlu0 %v3982_v55  ;;  %v3984_v56 = vpop.eup %3983 }
 0x590   :  { %v3986_v57 = vpop.eup %3985 }
 0x591   :  { %1001 = vadd.xlane.f32.xlu1 %v3984_v56  ;;  %v3988_v59 = vpop.eup %3987 }
 0x595   :  { %1003 = vadd.xlane.f32.xlu1 %v3986_v57 }
 0x599   :  { %1007 = vadd.xlane.f32.xlu1 %v3988_v59 }
 0x60a   :  { %v996_v60 = vpop.xlane.xlu1 %995 }
 0x60e   :  { %v994_v63 = vpop.xlane.xlu1 %993 }
 0x60f   :  { %3989 = vrcp.f32 %v994_v63 }
 0x610   :  { %3991 = vrcp.f32 %v996_v60 }
 0x612   :  { %v1000_v4 = vpop.xlane.xlu1 %999 }
 0x616   :  { %v998_v6 = vpop.xlane.xlu1 %997 }
 0x617   :  { %3993 = vrcp.f32 %v998_v6 }
 0x618   :  { %3995 = vrcp.f32 %v1000_v4  ;;  %v1006_v15 = vpop.xlane.xlu0 %1005 }
 0x61a   :  { %v1002_v0 = vpop.xlane.xlu1 %1001 }
 0x61b   :  { %3997 = vrcp.f32 %v1002_v0 }
 0x61c   :  { %v3990_v8 = vpop.eup %3989 }
 0x61d   :  { %v1017_v11 = vmul.f32 %v3990_v8, %v3976_v50  ;;  %v3992_v12 = vpop.eup %3991 }
 0x61e   :  { %v1004_v13 = vpop.xlane.xlu1 %1003  ;;  %v1018_v14 = vmul.f32 %v3992_v12, %v3974_v47 }
 0x61f   :  { %1025 = vxpose.xlu1.b32.start [1/8] (short) %v1017_v11, 128  ;;  %3999 = vrcp.f32 %v1004_v13 }
 0x620   :  { %4001 = vrcp.f32 %v1006_v15 }
 0x622   :  { %v1008_v19 = vpop.xlane.xlu1 %1007 }
 0x623   :  { %1026 = vxpose.xlu1.b32.cont [2/8] (short) %v1018_v14, 128  ;;  %4003 = vrcp.f32 %v1008_v19 }
 0x624   :  { %v3994_v16 = vpop.eup %3993 }
 0x625   :  { %v1019_v17 = vmul.f32 %v3994_v16, %v3980_v54  ;;  %v3996_v18 = vpop.eup %3995 }
 0x626   :  { %v1020_v20 = vmul.f32 %v3996_v18, %v3978_v53 }
 0x627   :  { %1027 = vxpose.xlu1.b32.cont [3/8] (short) %v1019_v17, 128 }
 0x628   :  { %v3998_v21 = vpop.eup %3997 }
 0x629   :  { %v1021_v22 = vmul.f32 %v3998_v21, %v3984_v56 }
 0x62b   :  { %1028 = vxpose.xlu1.b32.cont [4/8] (short) %v1020_v20, 128 }
 0x62c   :  { %v4000_v23 = vpop.eup %3999 }
 0x62d   :  { %v1022_v24 = vmul.f32 %v4000_v23, %v3986_v57  ;;  %v4002_v25 = vpop.eup %4001 }
 0x62e   :  { %v1023_v26 = vmul.f32 %v4002_v25, %v3982_v55 }
 0x62f   :  { %1029 = vxpose.xlu1.b32.cont [5/8] (short) %v1021_v22, 128 }
 0x630   :  { %v4004_v27 = vpop.eup %4003 }
 0x631   :  { %v1024_v28 = vmul.f32 %v4004_v27, %v3988_v59 }
 0x633   :  { %1030 = vxpose.xlu1.b32.cont [6/8] (short) %v1022_v24, 128 }
 0x637   :  { %1031 = vxpose.xlu1.b32.cont [7/8] (short) %v1023_v26, 128 }
 0x63b   :  { %1032 = vxpose.xlu1.b32.end [8/8] (short) %v1024_v28, 128 }
 0x69b   :  { %v1041_v29 = vpop.trf.xlu1 }
 0x69c   :  { %3652 = vmatprep.mubr.msk.f32.mxu1 %vm349_vm1, %v1041_v29  ;;  %3692 = vmatprep.mubr.msk.f32.mxu0 %vm349_vm1, %v1041_v29 }
 0x69f   :  { %v1042_v30 = vpop.trf.xlu1 }
 0x6a0   :  { %3653 = vmatmul.mubr.msk.f32.vlgmr.msra.gmra.mxu1 %vm349_vm1, %v1042_v30  ;;  %3693 = vmatmul.mubr.msk.f32.vlgmr.msra.gmra.mxu0 %vm349_vm1, %v1042_v30 }
 0x6a1   :  { %3731 = vmatpush3.msra.mxu0 %v4262_v5 }
 0x6a2   :  { %3732 = vmatprep.subr.mxu0 %v4266_v2 }
 0x6a3   :  { %3733 = vmatpush3.msra.mxu0 %v4266_v2  ;;  %v1043_v31 = vpop.trf.xlu1 }
 0x6a4   :  { %3734 = vmatprep.subr.mxu0 %v4258_v7  ;;  %3655 = vmatprep.mubr.msk.f32.mxu1 %vm349_vm1, %v1043_v31 }
 0x6a5   :  { %3735 = vmatpush3.msra.mxu0 %v4258_v7  ;;  %3695 = vmatprep.mubr.msk.f32.mxu0 %vm349_vm1, %v1043_v31 }
 0x6a6   :  { %3736 = vmatprep.subr.mxu0 %v4255_v1 }
 0x6a7   :  { %3737 = vmatpush3.msra.mxu0 %v4255_v1  ;;  %v1044_v32 = vpop.trf.xlu1 }
 0x6a8   :  { %3738 = vmatprep.subr.mxu0 %v4250_v3  ;;  %3656 = vmatmul.mubr.msk.f32.gmra.mxu1 %vm349_vm1, %v1044_v32 }
 0x6a9   :  { %3739 = vmatpush3.msra.mxu0 %v4250_v3 }
 0x6aa   :  { %3740 = vmatprep.subr.mxu0 %v4244_v61  ;;  %3696 = vmatmul.mubr.msk.f32.gmra.mxu0 %vm349_vm1, %v1044_v32 }
 0x6ab   :  { %3741 = vmatpush3.msra.mxu0 %v4244_v61  ;;  %v1045_v33 = vpop.trf.xlu1 }
 0x6ac   :  { %3742 = vmatprep.subr.mxu0 %v4247_v62  ;;  %3658 = vmatprep.mubr.msk.f32.mxu1 %vm349_vm1, %v1045_v33 }
 0x6ad   :  { %3743 = vmatpush3.msra.mxu0 %v4247_v62  ;;  %3698 = vmatprep.mubr.msk.f32.mxu0 %vm349_vm1, %v1045_v33 }
 0x6ae   :  { %3744 = vmatprep.subr.mxu0 %v4240_v58 }
 0x6af   :  { %3745 = vmatpush3.msra.mxu0 %v4240_v58  ;;  %v1046_v34 = vpop.trf.xlu1 }
 0x6b0   :  { %3659 = vmatmul.mubr.msk.f32.gmra.mxu1 %vm349_vm1, %v1046_v34  ;;  %3699 = vmatmul.mubr.msk.f32.gmra.mxu0 %vm349_vm1, %v1046_v34 }
 0x6b3   :  { %v1047_v35 = vpop.trf.xlu1 }
 0x6b4   :  { %3661 = vmatprep.mubr.msk.f32.mxu1 %vm349_vm1, %v1047_v35  ;;  %3701 = vmatprep.mubr.msk.f32.mxu0 %vm349_vm1, %v1047_v35 }
 0x6b7   :  { %v1048_v36 = vpop.trf.xlu1 }
 0x6b8   :  { %3662 = vmatmul.mubr.msk.f32.gmra.mxu1 %vm349_vm1, %v1048_v36  ;;  %3702 = vmatmul.mubr.msk.f32.gmra.mxu0 %vm349_vm1, %v1048_v36 }
 0x6bb   :  { %v1049_v37 = vpop.trf.xlu1 }
 0x6bc   :  { %3664 = vmatprep.mubr.msk.f32.mxu1 %vm349_vm1, %v1049_v37  ;;  %3704 = vmatprep.mubr.msk.f32.mxu0 %vm349_vm1, %v1049_v37 }
 0x6bf   :  { %v1050_v38 = vpop.trf.xlu1 }
 0x6c0   :  { %3665 = vmatmul.mubr.msk.f32.gmra.mxu1 %vm349_vm1, %v1050_v38  ;;  %3705 = vmatmul.mubr.msk.f32.gmra.mxu0 %vm349_vm1, %v1050_v38 }
 0x6c3   :  { %v1051_v39 = vpop.trf.xlu1 }
 0x6c4   :  { %3667 = vmatprep.mubr.msk.f32.mxu1 %vm349_vm1, %v1051_v39  ;;  %3707 = vmatprep.mubr.msk.f32.mxu0 %vm349_vm1, %v1051_v39 }
 0x6c7   :  { %v1052_v40 = vpop.trf.xlu1 }
 0x6c8   :  { %3668 = vmatmul.mubr.msk.f32.gmra.mxu1 %vm349_vm1, %v1052_v40  ;;  %3708 = vmatmul.mubr.msk.f32.gmra.mxu0 %vm349_vm1, %v1052_v40 }
 0x6cb   :  { %v1053_v41 = vpop.trf.xlu1 }
 0x6cc   :  { %3670 = vmatprep.mubr.msk.f32.mxu1 %vm349_vm1, %v1053_v41  ;;  %3710 = vmatprep.mubr.msk.f32.mxu0 %vm349_vm1, %v1053_v41 }
 0x6cf   :  { %v1054_v42 = vpop.trf.xlu1 }
 0x6d0   :  { %3671 = vmatmul.mubr.msk.f32.gmra.mxu1 %vm349_vm1, %v1054_v42  ;;  %3711 = vmatmul.mubr.msk.f32.gmra.mxu0 %vm349_vm1, %v1054_v42 }
 0x6d3   :  { %v1055_v43 = vpop.trf.xlu1 }
 0x6d4   :  { %3673 = vmatprep.mubr.msk.f32.mxu1 %vm349_vm1, %v1055_v43  ;;  %3713 = vmatprep.mubr.msk.f32.mxu0 %vm349_vm1, %v1055_v43 }
 0x6d7   :  { %v1056_v44 = vpop.trf.xlu1 }
 0x6d8   :  { %3674 = vmatmul.mubr.msk.f32.gmra.mxu1 %vm349_vm1, %v1056_v44  ;;  %3714 = vmatmul.mubr.msk.f32.gmra.mxu0 %vm349_vm1, %v1056_v44 }
 0x6d9   :  { %3718 = vmatprep.mubr.f32.mxu1 %v4240_v58 }
 0x760   :  { %v3654_v45 = vpop.f32.mrf.mxu1  ;;  %v3694_v46 = vpop.f32.mrf.mxu0 }
 0x762   :  { %v1316_v47 = vpop.f32.mrf.mxu0  ;;  %v1171_v48 = vpop.f32.mrf.mxu1 }
 0x763   :  { %4005 = vrcp.f32 %v1316_v47 }
 0x768   :  { %v3657_v49 = vpop.f32.mrf.mxu1 }
 0x76a   :  { %v3697_v50 = vpop.f32.mrf.mxu0  ;;  %v1181_v51 = vpop.f32.mrf.mxu1 }
 0x76c   :  { %v1326_v52 = vpop.f32.mrf.mxu0 }
 0x770   :  { %v4006_v53 = vpop.eup %4005  ;;  %v3660_v54 = vpop.f32.mrf.mxu1 }
 0x771   :  { %v3700_v55 = vpop.f32.mrf.mxu0  ;;  %1413 = vperm.xlu0 %3922, %v4006_v53  }
 0x772   :  { %v1191_v56 = vpop.f32.mrf.mxu1 }
 0x773   :  { %v1336_v57 = vpop.f32.mrf.mxu0 }
 0x778   :  { %v3663_v59 = vpop.f32.mrf.mxu1  ;;  %v3703_v60 = vpop.f32.mrf.mxu0 }
 0x77a   :  { %v1201_v63 = vpop.f32.mrf.mxu1  ;;  %v1346_v4 = vpop.f32.mrf.mxu0 }
 0x780   :  { %v3666_v6 = vpop.f32.mrf.mxu1  ;;  %v3706_v0 = vpop.f32.mrf.mxu0 }
 0x782   :  { %v1211_v8 = vpop.f32.mrf.mxu1  ;;  %v1356_v11 = vpop.f32.mrf.mxu0 }
 0x788   :  { %v3669_v12 = vpop.f32.mrf.mxu1  ;;  %v3709_v13 = vpop.f32.mrf.mxu0 }
 0x78a   :  { %v1221_v14 = vpop.f32.mrf.mxu1  ;;  %v1366_v15 = vpop.f32.mrf.mxu0 }
 0x790   :  { %v3672_v16 = vpop.f32.mrf.mxu1  ;;  %v3712_v17 = vpop.f32.mrf.mxu0 }
 0x792   :  { %v1231_v18 = vpop.f32.mrf.mxu1  ;;  %v1376_v19 = vpop.f32.mrf.mxu0 }
 0x798   :  { %v3675_v20 = vpop.f32.mrf.mxu1  ;;  %v3715_v21 = vpop.f32.mrf.mxu0 }
 0x79a   :  { %v1241_v22 = vpop.f32.mrf.mxu1  ;;  %v1386_v23 = vpop.f32.mrf.mxu0 }
 0x7ec   :  { %v1414_v24 = vpop.permute.xlu0 %1413 }
 0x7ed   :  { %v1491_v25 = vmul.f32 %v1414_v24, %v1171_v48 }
 0x7ef   :  { %v1523_v26 = vmul.f32 30.0, %v1491_v25 }
 0x7f1   :  { %3716 = vmatprep.subr.mxu1 %v1523_v26 }
 0x7f2   :  { %3717 = vmatpush3.xpose.msra.mxu1 %v1523_v26 }
 0x7f3   :  { %3770 = vmatprep.subr.mxu1 %v4107_v10 }
 0x7f5   :  { %3719 = vmatmul.mubr.f32.vlgmr.msra.gmra.mxu1 %v4247_v62 }
 0x7f6   :  { %3721 = vmatprep.mubr.f32.mxu1 %v4244_v61  ;;  %3771 = vmatpush3.msra.mxu1 %v4107_v10 }
 0x7f7   :  { %3772 = vmatprep.subr.mxu1 %v4107_v10 }
 0x7f8   :  { %3773 = vmatpush3.msra.mxu1 %v4107_v10 }
 0x7f9   :  { %3722 = vmatmul.mubr.f32.gmra.mxu1 %v4250_v3  ;;  %3774 = vmatprep.subr.mxu1 %v4107_v10 }
 0x7fa   :  { %3724 = vmatprep.mubr.f32.mxu1 %v4255_v1  ;;  %3775 = vmatpush3.msra.mxu1 %v4107_v10 }
 0x7fb   :  { %3776 = vmatprep.subr.mxu1 %v4107_v10 }
 0x7fc   :  { %3777 = vmatpush3.msra.mxu1 %v4107_v10 }
 0x7fd   :  { %3725 = vmatmul.mubr.f32.gmra.mxu1 %v4258_v7  ;;  %3778 = vmatprep.subr.mxu1 %v4107_v10 }
 0x7fe   :  { %3727 = vmatprep.mubr.f32.mxu1 %v4266_v2  ;;  %3779 = vmatpush3.msra.mxu1 %v4107_v10 }
 0x7ff   :  { %3780 = vmatprep.subr.mxu1 %v4107_v10 }
 0x800   :  { %3781 = vmatpush3.msra.mxu1 %v4107_v10 }
 0x801   :  { %3728 = vmatmul.mubr.f32.gmra.mxu1 %v4262_v5  ;;  %3782 = vmatprep.subr.mxu1 %v4107_v10 }
 0x802   :  { %3783 = vmatpush3.msra.mxu1 %v4107_v10 }
 0x803   :  { %3784 = vmatprep.subr.mxu1 %v4107_v10 }
 0x804   :  { %3785 = vmatpush3.msra.mxu1 %v4107_v10 }
 0x805   :  { %3824 = vmatprep.subr.mxu1 %v4262_v5 }
 0x8b5   :  { %v3720_v27 = vpop.f32.mrf.mxu1 }
 0x8b6   :  { %v1645_v28 = vsel %vm64_vm0, %v3720_v27, -1e+30 }
 0x8b7   :  { %v1654_v29 = vmul.f32 1.442695, %v1645_v28  ;;  %v1605_v30 = vpop.f32.mrf.mxu1 }
 0x8b8   :  { %v1644_v31 = vsel %vm64_vm0, %v1605_v30, -1e+30 }
 0x8b9   :  { %4007 = vpow2.f32 %v1654_v29  ;;  %v1652_v32 = vmul.f32 1.442695, %v1644_v31  ;;  %v3723_v33 = vpop.f32.mrf.mxu1 }
 0x8ba   :  { %v1647_v34 = vsel %vm64_vm0, %v3723_v33, -1e+30 }
 0x8bb   :  { %4009 = vpow2.f32 %v1652_v32  ;;  %v1658_v35 = vmul.f32 1.442695, %v1647_v34  ;;  %v1615_v36 = vpop.f32.mrf.mxu1 }
 0x8bc   :  { %v1646_v37 = vsel %vm64_vm0, %v1615_v36, -1e+30 }
 0x8bd   :  { %v1656_v38 = vmul.f32 1.442695, %v1646_v37  ;;  %v3726_v39 = vpop.f32.mrf.mxu1  ;;  %4011 = vpow2.f32 %v1658_v35 }
 0x8be   :  { %v1649_v40 = vsel %vm64_vm0, %v3726_v39, -1e+30 }
 0x8bf   :  { %4013 = vpow2.f32 %v1656_v38  ;;  %v1662_v41 = vmul.f32 1.442695, %v1649_v40  ;;  %v1625_v42 = vpop.f32.mrf.mxu1 }
 0x8c0   :  { %v1648_v43 = vsel %vm64_vm0, %v1625_v42, -1e+30 }
 0x8c1   :  { %v1660_v44 = vmul.f32 1.442695, %v1648_v43  ;;  %v3729_v45 = vpop.f32.mrf.mxu1  ;;  %4015 = vpow2.f32 %v1662_v41 }
 0x8c2   :  { %v1651_v46 = vsel %vm64_vm0, %v3729_v45, -1e+30 }
 0x8c3   :  { %4017 = vpow2.f32 %v1660_v44  ;;  %v1666_v47 = vmul.f32 1.442695, %v1651_v46  ;;  %v1635_v48 = vpop.f32.mrf.mxu1 }
 0x8c4   :  { %v1650_v49 = vsel %vm64_vm0, %v1635_v48, -1e+30 }
 0x8c5   :  { %v1664_v50 = vmul.f32 1.442695, %v1650_v49  ;;  %4019 = vpow2.f32 %v1666_v47 }
 0x8c6   :  { %v4008_v51 = vpop.eup %4007 }
 0x8c7   :  { %4021 = vpow2.f32 %v1664_v50  ;;  %1670 = vadd.xlane.f32.xlu0 %v4008_v51 }
 0x8c8   :  { %v4010_v52 = vpop.eup %4009 }
 0x8c9   :  { %1668 = vadd.xlane.f32.xlu1 %v4010_v52 }
 0x8ca   :  { %v4012_v53 = vpop.eup %4011 }
 0x8cc   :  { %v4014_v54 = vpop.eup %4013 }
 0x8cd   :  { %1674 = vadd.xlane.f32.xlu1 %v4012_v53  ;;  %1672 = vadd.xlane.f32.xlu0 %v4014_v54 }
 0x8ce   :  { %v4016_v55 = vpop.eup %4015 }
 0x8d0   :  { %v4018_v56 = vpop.eup %4017 }
 0x8d1   :  { %1678 = vadd.xlane.f32.xlu1 %v4016_v55  ;;  %1676 = vadd.xlane.f32.xlu0 %v4018_v56 }
 0x8d2   :  { %v4020_v57 = vpop.eup %4019 }
 0x8d4   :  { %v4022_v59 = vpop.eup %4021 }
 0x8d5   :  { %1682 = vadd.xlane.f32.xlu1 %v4020_v57  ;;  %1680 = vadd.xlane.f32.xlu0 %v4022_v59 }
 0x950   :  { %v1671_v60 = vpop.xlane.xlu0 %1670 }
 0x952   :  { %v1669_v63 = vpop.xlane.xlu1 %1668 }
 0x953   :  { %4023 = vrcp.f32 %v1669_v63 }
 0x954   :  { %4025 = vrcp.f32 %v1671_v60 }
 0x956   :  { %v1673_v4 = vpop.xlane.xlu0 %1672  ;;  %v1675_v6 = vpop.xlane.xlu1 %1674 }
 0x957   :  { %4027 = vrcp.f32 %v1673_v4 }
 0x958   :  { %4029 = vrcp.f32 %v1675_v6 }
 0x95a   :  { %v1677_v0 = vpop.xlane.xlu0 %1676  ;;  %v1679_v13 = vpop.xlane.xlu1 %1678 }
 0x95b   :  { %4031 = vrcp.f32 %v1677_v0 }
 0x95c   :  { %4033 = vrcp.f32 %v1679_v13 }
 0x95e   :  { %v1681_v16 = vpop.xlane.xlu0 %1680  ;;  %v1683_v19 = vpop.xlane.xlu1 %1682 }
 0x95f   :  { %4035 = vrcp.f32 %v1681_v16 }
 0x960   :  { %v4024_v8 = vpop.eup %4023  ;;  %4037 = vrcp.f32 %v1683_v19 }
 0x961   :  { %v1692_v11 = vmul.f32 %v4024_v8, %v4010_v52  ;;  %v4026_v12 = vpop.eup %4025 }
 0x962   :  { %v1693_v14 = vmul.f32 %v4026_v12, %v4008_v51 }
 0x963   :  { %1700 = vxpose.xlu0.b32.start [1/8] (short) %v1692_v11, 128 }
 0x964   :  { %v4028_v15 = vpop.eup %4027 }
 0x965   :  { %v1694_v17 = vmul.f32 %v4028_v15, %v4014_v54  ;;  %v4030_v18 = vpop.eup %4029 }
 0x966   :  { %v1695_v20 = vmul.f32 %v4030_v18, %v4012_v53 }
 0x967   :  { %1701 = vxpose.xlu0.b32.cont [2/8] (short) %v1693_v14, 128 }
 0x968   :  { %v4032_v21 = vpop.eup %4031 }
 0x969   :  { %v1696_v22 = vmul.f32 %v4032_v21, %v4018_v56  ;;  %v4034_v23 = vpop.eup %4033 }
 0x96a   :  { %v1697_v24 = vmul.f32 %v4034_v23, %v4016_v55 }
 0x96b   :  { %1702 = vxpose.xlu0.b32.cont [3/8] (short) %v1694_v17, 128 }
 0x96c   :  { %v4036_v25 = vpop.eup %4035 }
 0x96d   :  { %v1698_v26 = vmul.f32 %v4036_v25, %v4022_v59  ;;  %v4038_v27 = vpop.eup %4037 }
 0x96e   :  { %v1699_v28 = vmul.f32 %v4038_v27, %v4020_v57 }
 0x96f   :  { %1703 = vxpose.xlu0.b32.cont [4/8] (short) %v1695_v20, 128 }
 0x973   :  { %1704 = vxpose.xlu0.b32.cont [5/8] (short) %v1696_v22, 128 }
 0x977   :  { %1705 = vxpose.xlu0.b32.cont [6/8] (short) %v1697_v24, 128 }
 0x97b   :  { %1706 = vxpose.xlu0.b32.cont [7/8] (short) %v1698_v26, 128 }
 0x97f   :  { %1707 = vxpose.xlu0.b32.end [8/8] (short) %v1699_v28, 128 }
 0x9df   :  { %v1716_v29 = vpop.trf.xlu0 }
 0x9e0   :  { %3746 = vmatprep.mubr.msk.f32.mxu0 %vm349_vm1, %v1716_v29  ;;  %3786 = vmatprep.mubr.msk.f32.mxu1 %vm349_vm1, %v1716_v29 }
 0x9e3   :  { %v1717_v30 = vpop.trf.xlu0 }
 0x9e4   :  { %3747 = vmatmul.mubr.msk.f32.vlgmr.msra.gmra.mxu0 %vm349_vm1, %v1717_v30  ;;  %3787 = vmatmul.mubr.msk.f32.vlgmr.msra.gmra.mxu1 %vm349_vm1, %v1717_v30 }
 0x9e5   :  { %3825 = vmatpush3.msra.mxu1 %v4262_v5 }
 0x9e6   :  { %3826 = vmatprep.subr.mxu1 %v4266_v2 }
 0x9e7   :  { %3827 = vmatpush3.msra.mxu1 %v4266_v2  ;;  %v1718_v31 = vpop.trf.xlu0 }
 0x9e8   :  { %3828 = vmatprep.subr.mxu1 %v4258_v7  ;;  %3749 = vmatprep.mubr.msk.f32.mxu0 %vm349_vm1, %v1718_v31 }
 0x9e9   :  { %3829 = vmatpush3.msra.mxu1 %v4258_v7  ;;  %3789 = vmatprep.mubr.msk.f32.mxu1 %vm349_vm1, %v1718_v31 }
 0x9ea   :  { %3830 = vmatprep.subr.mxu1 %v4255_v1 }
 0x9eb   :  { %3831 = vmatpush3.msra.mxu1 %v4255_v1  ;;  %v1719_v32 = vpop.trf.xlu0 }
 0x9ec   :  { %3832 = vmatprep.subr.mxu1 %v4250_v3  ;;  %3750 = vmatmul.mubr.msk.f32.gmra.mxu0 %vm349_vm1, %v1719_v32 }
 0x9ed   :  { %3833 = vmatpush3.msra.mxu1 %v4250_v3 }
 0x9ee   :  { %3834 = vmatprep.subr.mxu1 %v4244_v61  ;;  %3790 = vmatmul.mubr.msk.f32.gmra.mxu1 %vm349_vm1, %v1719_v32 }
 0x9ef   :  { %3835 = vmatpush3.msra.mxu1 %v4244_v61  ;;  %v1720_v33 = vpop.trf.xlu0 }
 0x9f0   :  { %3836 = vmatprep.subr.mxu1 %v4247_v62  ;;  %3752 = vmatprep.mubr.msk.f32.mxu0 %vm349_vm1, %v1720_v33 }
 0x9f1   :  { %3837 = vmatpush3.msra.mxu1 %v4247_v62  ;;  %3792 = vmatprep.mubr.msk.f32.mxu1 %vm349_vm1, %v1720_v33 }
 0x9f2   :  { %3838 = vmatprep.subr.mxu1 %v4240_v58 }
 0x9f3   :  { %3839 = vmatpush3.msra.mxu1 %v4240_v58  ;;  %v1721_v34 = vpop.trf.xlu0 }
 0x9f4   :  { %3753 = vmatmul.mubr.msk.f32.gmra.mxu0 %vm349_vm1, %v1721_v34  ;;  %3793 = vmatmul.mubr.msk.f32.gmra.mxu1 %vm349_vm1, %v1721_v34 }
 0x9f7   :  { %v1722_v35 = vpop.trf.xlu0 }
 0x9f8   :  { %3755 = vmatprep.mubr.msk.f32.mxu0 %vm349_vm1, %v1722_v35  ;;  %3795 = vmatprep.mubr.msk.f32.mxu1 %vm349_vm1, %v1722_v35 }
 0x9fb   :  { %v1723_v36 = vpop.trf.xlu0 }
 0x9fc   :  { %3756 = vmatmul.mubr.msk.f32.gmra.mxu0 %vm349_vm1, %v1723_v36  ;;  %3796 = vmatmul.mubr.msk.f32.gmra.mxu1 %vm349_vm1, %v1723_v36 }
 0x9ff   :  { %v1724_v37 = vpop.trf.xlu0 }
 0xa00   :  { %3758 = vmatprep.mubr.msk.f32.mxu0 %vm349_vm1, %v1724_v37  ;;  %3798 = vmatprep.mubr.msk.f32.mxu1 %vm349_vm1, %v1724_v37 }
 0xa03   :  { %v1725_v38 = vpop.trf.xlu0 }
 0xa04   :  { %3759 = vmatmul.mubr.msk.f32.gmra.mxu0 %vm349_vm1, %v1725_v38  ;;  %3799 = vmatmul.mubr.msk.f32.gmra.mxu1 %vm349_vm1, %v1725_v38 }
 0xa07   :  { %v1726_v39 = vpop.trf.xlu0 }
 0xa08   :  { %3761 = vmatprep.mubr.msk.f32.mxu0 %vm349_vm1, %v1726_v39  ;;  %3801 = vmatprep.mubr.msk.f32.mxu1 %vm349_vm1, %v1726_v39 }
 0xa0b   :  { %v1727_v40 = vpop.trf.xlu0 }
 0xa0c   :  { %3762 = vmatmul.mubr.msk.f32.gmra.mxu0 %vm349_vm1, %v1727_v40  ;;  %3802 = vmatmul.mubr.msk.f32.gmra.mxu1 %vm349_vm1, %v1727_v40 }
 0xa0f   :  { %v1728_v41 = vpop.trf.xlu0 }
 0xa10   :  { %3764 = vmatprep.mubr.msk.f32.mxu0 %vm349_vm1, %v1728_v41  ;;  %3804 = vmatprep.mubr.msk.f32.mxu1 %vm349_vm1, %v1728_v41 }
 0xa13   :  { %v1729_v42 = vpop.trf.xlu0 }
 0xa14   :  { %3765 = vmatmul.mubr.msk.f32.gmra.mxu0 %vm349_vm1, %v1729_v42  ;;  %3805 = vmatmul.mubr.msk.f32.gmra.mxu1 %vm349_vm1, %v1729_v42 }
 0xa17   :  { %v1730_v43 = vpop.trf.xlu0 }
 0xa18   :  { %3767 = vmatprep.mubr.msk.f32.mxu0 %vm349_vm1, %v1730_v43  ;;  %3807 = vmatprep.mubr.msk.f32.mxu1 %vm349_vm1, %v1730_v43 }
 0xa1b   :  { %v1731_v44 = vpop.trf.xlu0 }
 0xa1c   :  { %3768 = vmatmul.mubr.msk.f32.gmra.mxu0 %vm349_vm1, %v1731_v44  ;;  %3808 = vmatmul.mubr.msk.f32.gmra.mxu1 %vm349_vm1, %v1731_v44 }
 0xa1d   :  { %3812 = vmatprep.mubr.f32.mxu0 %v4240_v58 }
 0xaa4   :  { %v3748_v45 = vpop.f32.mrf.mxu0  ;;  %v3788_v46 = vpop.f32.mrf.mxu1 }
 0xaa6   :  { %v1991_v47 = vpop.f32.mrf.mxu1  ;;  %v1846_v48 = vpop.f32.mrf.mxu0 }
 0xaa7   :  { %4039 = vrcp.f32 %v1991_v47 }
 0xaac   :  { %v3751_v49 = vpop.f32.mrf.mxu0 }
 0xaae   :  { %v3791_v50 = vpop.f32.mrf.mxu1  ;;  %v1856_v51 = vpop.f32.mrf.mxu0 }
 0xab0   :  { %v2001_v52 = vpop.f32.mrf.mxu1 }
 0xab4   :  { %v4040_v53 = vpop.eup %4039  ;;  %v3754_v54 = vpop.f32.mrf.mxu0 }
 0xab5   :  { %v3794_v55 = vpop.f32.mrf.mxu1  ;;  %2088 = vperm.xlu1 %3921, %v4040_v53  }
 0xab6   :  { %v1866_v56 = vpop.f32.mrf.mxu0 }
 0xab7   :  { %v2011_v57 = vpop.f32.mrf.mxu1 }
 0xabc   :  { %v3757_v59 = vpop.f32.mrf.mxu0  ;;  %v3797_v60 = vpop.f32.mrf.mxu1 }
 0xabe   :  { %v1876_v63 = vpop.f32.mrf.mxu0  ;;  %v2021_v4 = vpop.f32.mrf.mxu1 }
 0xac4   :  { %v3760_v6 = vpop.f32.mrf.mxu0  ;;  %v3800_v0 = vpop.f32.mrf.mxu1 }
 0xac6   :  { %v1886_v8 = vpop.f32.mrf.mxu0  ;;  %v2031_v11 = vpop.f32.mrf.mxu1 }
 0xacc   :  { %v3763_v12 = vpop.f32.mrf.mxu0  ;;  %v3803_v13 = vpop.f32.mrf.mxu1 }
 0xace   :  { %v1896_v14 = vpop.f32.mrf.mxu0  ;;  %v2041_v15 = vpop.f32.mrf.mxu1 }
 0xad4   :  { %v3766_v16 = vpop.f32.mrf.mxu0  ;;  %v3806_v17 = vpop.f32.mrf.mxu1 }
 0xad6   :  { %v1906_v18 = vpop.f32.mrf.mxu0  ;;  %v2051_v19 = vpop.f32.mrf.mxu1 }
 0xadc   :  { %v3769_v20 = vpop.f32.mrf.mxu0  ;;  %v3809_v21 = vpop.f32.mrf.mxu1 }
 0xade   :  { %v1916_v22 = vpop.f32.mrf.mxu0  ;;  %v2061_v23 = vpop.f32.mrf.mxu1 }
 0xb30   :  { %v2089_v24 = vpop.permute.xlu1 %2088 }
 0xb31   :  { %v2166_v25 = vmul.f32 %v2089_v24, %v1846_v48 }
 0xb33   :  { %v2198_v26 = vmul.f32 30.0, %v2166_v25 }
 0xb35   :  { %3810 = vmatprep.subr.mxu0 %v2198_v26 }
 0xb36   :  { %3811 = vmatpush3.xpose.msra.mxu0 %v2198_v26 }
 0xb37   :  { %3864 = vmatprep.subr.mxu0 %v4107_v10 }
 0xb39   :  { %3813 = vmatmul.mubr.f32.vlgmr.msra.gmra.mxu0 %v4247_v62 }
 0xb3a   :  { %3815 = vmatprep.mubr.f32.mxu0 %v4244_v61  ;;  %3865 = vmatpush3.msra.mxu0 %v4107_v10 }
 0xb3b   :  { %3866 = vmatprep.subr.mxu0 %v4107_v10 }
 0xb3c   :  { %3867 = vmatpush3.msra.mxu0 %v4107_v10 }
 0xb3d   :  { %3816 = vmatmul.mubr.f32.gmra.mxu0 %v4250_v3  ;;  %3868 = vmatprep.subr.mxu0 %v4107_v10 }
 0xb3e   :  { %3818 = vmatprep.mubr.f32.mxu0 %v4255_v1  ;;  %3869 = vmatpush3.msra.mxu0 %v4107_v10 }
 0xb3f   :  { %3870 = vmatprep.subr.mxu0 %v4107_v10 }
 0xb40   :  { %3871 = vmatpush3.msra.mxu0 %v4107_v10 }
 0xb41   :  { %3819 = vmatmul.mubr.f32.gmra.mxu0 %v4258_v7  ;;  %3872 = vmatprep.subr.mxu0 %v4107_v10 }
 0xb42   :  { %3821 = vmatprep.mubr.f32.mxu0 %v4266_v2  ;;  %3873 = vmatpush3.msra.mxu0 %v4107_v10 }
 0xb43   :  { %3874 = vmatprep.subr.mxu0 %v4107_v10 }
 0xb44   :  { %3875 = vmatpush3.msra.mxu0 %v4107_v10 }
 0xb45   :  { %3822 = vmatmul.mubr.f32.gmra.mxu0 %v4262_v5  ;;  %3876 = vmatprep.subr.mxu0 %v4107_v10 }
 0xb46   :  { %3877 = vmatpush3.msra.mxu0 %v4107_v10 }
 0xb47   :  { %3878 = vmatprep.subr.mxu0 %v4107_v10 }
 0xb48   :  { %3879 = vmatpush3.msra.mxu0 %v4107_v10 }
 0xbf9   :  { %v3814_v27 = vpop.f32.mrf.mxu0 }
 0xbfa   :  { %v2320_v28 = vsel %vm64_vm0, %v3814_v27, -1e+30 }
 0xbfb   :  { %v2329_v29 = vmul.f32 1.442695, %v2320_v28  ;;  %v2280_v30 = vpop.f32.mrf.mxu0 }
 0xbfc   :  { %v2319_v31 = vsel %vm64_vm0, %v2280_v30, -1e+30 }
 0xbfd   :  { %4041 = vpow2.f32 %v2329_v29  ;;  %v2327_v32 = vmul.f32 1.442695, %v2319_v31  ;;  %v3817_v33 = vpop.f32.mrf.mxu0 }
 0xbfe   :  { %v2322_v34 = vsel %vm64_vm0, %v3817_v33, -1e+30 }
 0xbff   :  { %v2290_v35 = vpop.f32.mrf.mxu0  ;;  %4043 = vpow2.f32 %v2327_v32  ;;  %v2333_v36 = vmul.f32 1.442695, %v2322_v34 }
 0xc00   :  { %v2321_v10 = vsel %vm64_vm0, %v2290_v35, -1e+30 }
 0xc01   :  { %v3820_v37 = vpop.f32.mrf.mxu0  ;;  %4045 = vpow2.f32 %v2333_v36  ;;  %v2331_v39 = vmul.f32 1.442695, %v2321_v10 }
 0xc02   :  { %v2324_v47 = vsel %vm64_vm0, %v3820_v37, -1e+30 }
 0xc03   :  { %v2300_v38 = vpop.f32.mrf.mxu0  ;;  %4047 = vpow2.f32 %v2331_v39  ;;  %v2337_v48 = vmul.f32 1.442695, %v2324_v47 }
 0xc04   :  { %v2323_v41 = vsel %vm64_vm0, %v2300_v38, -1e+30 }
 0xc05   :  { %v3823_v40 = vpop.f32.mrf.mxu0  ;;  %v2335_v44 = vmul.f32 1.442695, %v2323_v41 }
 0xc06   :  { %v2326_v50 = vsel %vm64_vm0, %v3823_v40, -1e+30 }
 0xc07   :  { %v2310_v42 = vpop.f32.mrf.mxu0  ;;  %v2341_v51 = vmul.f32 1.442695, %v2326_v50 }
 0xc08   :  { %v2325_v43 = vsel %vm64_vm0, %v2310_v42, -1e+30 }
 0xc09   :  { %v2339_v45 = vmul.f32 1.442695, %v2325_v43  ;;  %v4109_v43 = vmov 0.0  }
 0xc0a   :  { %v4042_v46 = vpop.eup %4041  ;;  %2874 = vst [vmem:[%s4740_s2 + $0x8] sm:$0xff] %v4109_v43  ;;  %2875 = vst [vmem:[%s4740_s2 + $0x10] sm:$0xff] %v4109_v43 }
 0xc0b   :  { %4049 = vpow2.f32 %v2339_v45  ;;  %2345 = vadd.xlane.f32.xlu1 %v4042_v46  ;;  %2876 = vst [vmem:[%s4740_s2 + $0x18] sm:$0xff] %v4109_v43  ;;  %2877 = vst [vmem:[%s4740_s2 + $0x20] sm:$0xff] %v4109_v43 }
 0xc0c   :  { %4051 = vpow2.f32 %v2335_v44  ;;  %v4044_v49 = vpop.eup %4043  ;;  %2878 = vst [vmem:[%s4740_s2 + $0x28] sm:$0xff] %v4109_v43  ;;  %2879 = vst [vmem:[%s4740_s2 + $0x30] sm:$0xff] %v4109_v43 }
 0xc0d   :  { %4053 = vpow2.f32 %v2337_v48  ;;  %2880 = vst [vmem:[%s4740_s2 + $0x38] sm:$0xff] %v4109_v43  ;;  %2881 = vst [vmem:[%s4740_s2 + $0x40] sm:$0xff] %v4109_v43 }
 0xc0e   :  { %v4046_v52 = vpop.eup %4045  ;;  %4055 = vpow2.f32 %v2341_v51  ;;  %2882 = vst [vmem:[%s4740_s2 + $0x48] sm:$0xff] %v4109_v43  ;;  %2883 = vst [vmem:[%s4740_s2 + $0x50] sm:$0xff] %v4109_v43 }
 0xc0f   :  { %2343 = vadd.xlane.f32.xlu1 %v4044_v49  ;;  %2884 = vst [vmem:[%s4740_s2 + $0x58] sm:$0xff] %v4109_v43  ;;  %2885 = vst [vmem:[%s4740_s2 + $0x60] sm:$0xff] %v4109_v43 }
 0xc10   :  { %v4048_v53 = vpop.eup %4047  ;;  %2886 = vst [vmem:[%s4740_s2 + $0x68] sm:$0xff] %v4109_v43  ;;  %2887 = vst [vmem:[%s4740_s2 + $0x70] sm:$0xff] %v4109_v43 }
 0xc11   :  { %2888 = vst [vmem:[%s4740_s2 + $0x78] sm:$0xff] %v4109_v43 }
 0xc13   :  { %2349 = vadd.xlane.f32.xlu1 %v4046_v52 }
 0xc17   :  { %2347 = vadd.xlane.f32.xlu1 %v4048_v53 }
 0xc18   :  { %v4050_v54 = vpop.eup %4049 }
 0xc19   :  { %2355 = vadd.xlane.f32.xlu0 %v4050_v54  ;;  %v4052_v55 = vpop.eup %4051 }
 0xc1a   :  { %v4054_v56 = vpop.eup %4053 }
 0xc1b   :  { %2351 = vadd.xlane.f32.xlu1 %v4052_v55  ;;  %v4056_v57 = vpop.eup %4055 }
 0xc1f   :  { %2353 = vadd.xlane.f32.xlu1 %v4054_v56 }
 0xc23   :  { %2357 = vadd.xlane.f32.xlu1 %v4056_v57 }
 0xc94   :  { %v2346_v59 = vpop.xlane.xlu1 %2345 }
 0xc98   :  { %v2344_v60 = vpop.xlane.xlu1 %2343 }
 0xc99   :  { %4057 = vrcp.f32 %v2344_v60 }
 0xc9a   :  { %4059 = vrcp.f32 %v2346_v59 }
 0xc9c   :  { %v2350_v63 = vpop.xlane.xlu1 %2349 }
 0xca0   :  { %v2348_v4 = vpop.xlane.xlu1 %2347 }
 0xca1   :  { %4061 = vrcp.f32 %v2348_v4 }
 0xca2   :  { %4063 = vrcp.f32 %v2350_v63  ;;  %v2356_v14 = vpop.xlane.xlu0 %2355 }
 0xca4   :  { %v2352_v6 = vpop.xlane.xlu1 %2351 }
 0xca5   :  { %4065 = vrcp.f32 %v2352_v6 }
 0xca6   :  { %v4058_v0 = vpop.eup %4057 }
 0xca7   :  { %v2367_v8 = vmul.f32 %v4058_v0, %v4044_v49  ;;  %v4060_v11 = vpop.eup %4059 }
 0xca8   :  { %v2354_v12 = vpop.xlane.xlu1 %2353  ;;  %v2368_v13 = vmul.f32 %v4060_v11, %v4042_v46 }
 0xca9   :  { %2375 = vxpose.xlu1.b32.start [1/8] (short) %v2367_v8, 128  ;;  %4067 = vrcp.f32 %v2354_v12 }
 0xcaa   :  { %4069 = vrcp.f32 %v2356_v14 }
 0xcac   :  { %v2358_v18 = vpop.xlane.xlu1 %2357 }
 0xcad   :  { %2376 = vxpose.xlu1.b32.cont [2/8] (short) %v2368_v13, 128  ;;  %4071 = vrcp.f32 %v2358_v18 }
 0xcae   :  { %v4062_v15 = vpop.eup %4061 }
 0xcaf   :  { %v2369_v16 = vmul.f32 %v4062_v15, %v4048_v53  ;;  %v4064_v17 = vpop.eup %4063 }
 0xcb0   :  { %v2370_v19 = vmul.f32 %v4064_v17, %v4046_v52 }
 0xcb1   :  { %2377 = vxpose.xlu1.b32.cont [3/8] (short) %v2369_v16, 128 }
 0xcb2   :  { %v4066_v20 = vpop.eup %4065 }
 0xcb3   :  { %v2371_v21 = vmul.f32 %v4066_v20, %v4052_v55 }
 0xcb5   :  { %2378 = vxpose.xlu1.b32.cont [4/8] (short) %v2370_v19, 128 }
 0xcb6   :  { %v4068_v22 = vpop.eup %4067 }
 0xcb7   :  { %v2372_v23 = vmul.f32 %v4068_v22, %v4054_v56  ;;  %v4070_v24 = vpop.eup %4069 }
 0xcb8   :  { %v2373_v25 = vmul.f32 %v4070_v24, %v4050_v54 }
 0xcb9   :  { %2379 = vxpose.xlu1.b32.cont [5/8] (short) %v2371_v21, 128 }
 0xcba   :  { %v4072_v26 = vpop.eup %4071 }
 0xcbb   :  { %v2374_v27 = vmul.f32 %v4072_v26, %v4056_v57 }
 0xcbd   :  { %2380 = vxpose.xlu1.b32.cont [6/8] (short) %v2372_v23, 128 }
 0xcc1   :  { %2381 = vxpose.xlu1.b32.cont [7/8] (short) %v2373_v25, 128 }
 0xcc5   :  { %2382 = vxpose.xlu1.b32.end [8/8] (short) %v2374_v27, 128 }
 0xd25   :  { %v2391_v28 = vpop.trf.xlu1 }
 0xd26   :  { %3840 = vmatprep.mubr.msk.f32.mxu1 %vm349_vm1, %v2391_v28  ;;  %3880 = vmatprep.mubr.msk.f32.mxu0 %vm349_vm1, %v2391_v28 }
 0xd29   :  { %v2392_v29 = vpop.trf.xlu1 }
 0xd2a   :  { %3841 = vmatmul.mubr.msk.f32.vlgmr.msra.gmra.mxu1 %vm349_vm1, %v2392_v29  ;;  %3881 = vmatmul.mubr.msk.f32.vlgmr.msra.gmra.mxu0 %vm349_vm1, %v2392_v29 }
 0xd2d   :  { %v2393_v30 = vpop.trf.xlu1 }
 0xd2e   :  { %3843 = vmatprep.mubr.msk.f32.mxu1 %vm349_vm1, %v2393_v30  ;;  %3883 = vmatprep.mubr.msk.f32.mxu0 %vm349_vm1, %v2393_v30 }
 0xd31   :  { %v2394_v31 = vpop.trf.xlu1 }
 0xd32   :  { %3844 = vmatmul.mubr.msk.f32.gmra.mxu1 %vm349_vm1, %v2394_v31  ;;  %3884 = vmatmul.mubr.msk.f32.gmra.mxu0 %vm349_vm1, %v2394_v31 }
 0xd35   :  { %v2395_v32 = vpop.trf.xlu1 }
 0xd36   :  { %3846 = vmatprep.mubr.msk.f32.mxu1 %vm349_vm1, %v2395_v32  ;;  %3886 = vmatprep.mubr.msk.f32.mxu0 %vm349_vm1, %v2395_v32 }
 0xd39   :  { %v2396_v33 = vpop.trf.xlu1 }
 0xd3a   :  { %3847 = vmatmul.mubr.msk.f32.gmra.mxu1 %vm349_vm1, %v2396_v33  ;;  %3887 = vmatmul.mubr.msk.f32.gmra.mxu0 %vm349_vm1, %v2396_v33 }
 0xd3d   :  { %v2397_v34 = vpop.trf.xlu1 }
 0xd3e   :  { %3849 = vmatprep.mubr.msk.f32.mxu1 %vm349_vm1, %v2397_v34  ;;  %3889 = vmatprep.mubr.msk.f32.mxu0 %vm349_vm1, %v2397_v34 }
 0xd41   :  { %v2398_v35 = vpop.trf.xlu1 }
 0xd42   :  { %3850 = vmatmul.mubr.msk.f32.gmra.mxu1 %vm349_vm1, %v2398_v35  ;;  %3890 = vmatmul.mubr.msk.f32.gmra.mxu0 %vm349_vm1, %v2398_v35 }
 0xd45   :  { %v2399_v36 = vpop.trf.xlu1 }
 0xd46   :  { %3852 = vmatprep.mubr.msk.f32.mxu1 %vm349_vm1, %v2399_v36  ;;  %3892 = vmatprep.mubr.msk.f32.mxu0 %vm349_vm1, %v2399_v36 }
 0xd49   :  { %v2400_v37 = vpop.trf.xlu1 }
 0xd4a   :  { %3853 = vmatmul.mubr.msk.f32.gmra.mxu1 %vm349_vm1, %v2400_v37  ;;  %3893 = vmatmul.mubr.msk.f32.gmra.mxu0 %vm349_vm1, %v2400_v37 }
 0xd4d   :  { %v2401_v10 = vpop.trf.xlu1 }
 0xd4e   :  { %3855 = vmatprep.mubr.msk.f32.mxu1 %vm349_vm1, %v2401_v10  ;;  %3895 = vmatprep.mubr.msk.f32.mxu0 %vm349_vm1, %v2401_v10 }
 0xd51   :  { %v2402_v38 = vpop.trf.xlu1 }
 0xd52   :  { %3856 = vmatmul.mubr.msk.f32.gmra.mxu1 %vm349_vm1, %v2402_v38  ;;  %3896 = vmatmul.mubr.msk.f32.gmra.mxu0 %vm349_vm1, %v2402_v38 }
 0xd55   :  { %v2403_v39 = vpop.trf.xlu1 }
 0xd56   :  { %3858 = vmatprep.mubr.msk.f32.mxu1 %vm349_vm1, %v2403_v39  ;;  %3898 = vmatprep.mubr.msk.f32.mxu0 %vm349_vm1, %v2403_v39 }
 0xd59   :  { %v2404_v40 = vpop.trf.xlu1 }
 0xd5a   :  { %3859 = vmatmul.mubr.msk.f32.gmra.mxu1 %vm349_vm1, %v2404_v40  ;;  %3899 = vmatmul.mubr.msk.f32.gmra.mxu0 %vm349_vm1, %v2404_v40 }
 0xd5d   :  { %v2405_v41 = vpop.trf.xlu1 }
 0xd5e   :  { %3861 = vmatprep.mubr.msk.f32.mxu1 %vm349_vm1, %v2405_v41  ;;  %3901 = vmatprep.mubr.msk.f32.mxu0 %vm349_vm1, %v2405_v41 }
 0xd61   :  { %v2406_v42 = vpop.trf.xlu1 }
 0xd62   :  { %3862 = vmatmul.mubr.msk.f32.gmra.mxu1 %vm349_vm1, %v2406_v42  ;;  %3902 = vmatmul.mubr.msk.f32.gmra.mxu0 %vm349_vm1, %v2406_v42 }
 0xd63   :  { %3906 = vmatprep.mubr.f32.mxu1 %v4240_v58 }
 0xdea   :  { %v3842_v58 = vpop.f32.mrf.mxu1  ;;  %v3882_v44 = vpop.f32.mrf.mxu0 }
 0xdec   :  { %v2666_v45 = vpop.f32.mrf.mxu0  ;;  %v2521_v46 = vpop.f32.mrf.mxu1 }
 0xded   :  { %4073 = vrcp.f32 %v2666_v45 }
 0xdf2   :  { %v3845_v47 = vpop.f32.mrf.mxu1  ;;  %v3885_v48 = vpop.f32.mrf.mxu0 }
 0xdf4   :  { %v2531_v49 = vpop.f32.mrf.mxu1  ;;  %v2676_v50 = vpop.f32.mrf.mxu0 }
 0xdfa   :  { %v4074_v51 = vpop.eup %4073  ;;  %v3848_v52 = vpop.f32.mrf.mxu1 }
 0xdfb   :  { %v3888_v53 = vpop.f32.mrf.mxu0  ;;  %2763 = vperm.xlu0 %3922, %v4074_v51  }
 0xdfc   :  { %v2541_v54 = vpop.f32.mrf.mxu1 }
 0xdfd   :  { %v2686_v55 = vpop.f32.mrf.mxu0 }
 0xe02   :  { %v3851_v56 = vpop.f32.mrf.mxu1  ;;  %v3891_v57 = vpop.f32.mrf.mxu0 }
 0xe04   :  { %v2551_v59 = vpop.f32.mrf.mxu1  ;;  %v2696_v60 = vpop.f32.mrf.mxu0 }
 0xe0a   :  { %v3854_v63 = vpop.f32.mrf.mxu1  ;;  %v3894_v4 = vpop.f32.mrf.mxu0 }
 0xe0c   :  { %v2561_v6 = vpop.f32.mrf.mxu1  ;;  %v2706_v0 = vpop.f32.mrf.mxu0 }
 0xe12   :  { %v3857_v8 = vpop.f32.mrf.mxu1  ;;  %v3897_v11 = vpop.f32.mrf.mxu0 }
 0xe14   :  { %v2571_v12 = vpop.f32.mrf.mxu1  ;;  %v2716_v13 = vpop.f32.mrf.mxu0 }
 0xe1a   :  { %v3860_v14 = vpop.f32.mrf.mxu1  ;;  %v3900_v15 = vpop.f32.mrf.mxu0 }
 0xe1c   :  { %v2581_v16 = vpop.f32.mrf.mxu1  ;;  %v2726_v17 = vpop.f32.mrf.mxu0 }
 0xe22   :  { %v3863_v18 = vpop.f32.mrf.mxu1  ;;  %v3903_v19 = vpop.f32.mrf.mxu0 }
 0xe24   :  { %v2591_v20 = vpop.f32.mrf.mxu1  ;;  %v2736_v21 = vpop.f32.mrf.mxu0 }
 0xe76   :  { %v2764_v22 = vpop.permute.xlu0 %2763 }
 0xe77   :  { %v2841_v23 = vmul.f32 %v2764_v22, %v2521_v46 }
 0xe79   :  { %2873 = vst [vmem:[%s4740_s2] sm:$0xff] %v2841_v23  ;;  %3904 = vmatprep.subr.mxu1 %v2841_v23 }
 0xe7a   :  { %3905 = vmatpush3.xpose.msra.mxu1 %v2841_v23 }
 0xe7d   :  { %3907 = vmatmul.mubr.f32.vlgmr.msra.gmra.mxu1 %v4247_v62 }
 0xe7e   :  { %3909 = vmatprep.mubr.f32.mxu1 %v4244_v61 }
 0xe81   :  { %3910 = vmatmul.mubr.f32.gmra.mxu1 %v4250_v3 }
 0xe82   :  { %3912 = vmatprep.mubr.f32.mxu1 %v4255_v1 }
 0xe85   :  { %3913 = vmatmul.mubr.f32.gmra.mxu1 %v4258_v7 }
 0xe86   :  { %3915 = vmatprep.mubr.f32.mxu1 %v4266_v2 }
 0xe89   :  { %3916 = vmatmul.mubr.f32.gmra.mxu1 %v4262_v5 }
 0xf3d   :  { %v3908_v24 = vpop.f32.mrf.mxu1 }
 0xf3e   :  { %v2995_v25 = vmul.f32 30.0, %v3908_v24  ;;  %3099 = vst [vmem:[%s4741_s4 + $0x8] sm:$0xff] %v3908_v24 }
 0xf3f   :  { %v2955_v26 = vpop.f32.mrf.mxu1 }
 0xf40   :  { %v2994_v62 = vmul.f32 30.0, %v2955_v26  ;;  %3098 = vst [vmem:[%s4741_s4] sm:$0xff] %v2955_v26  ;;  %v3003_v61 = vsel %vm64_vm0, %v2995_v25, -1e+30 }
 0xf41   :  { %3012 = vmax.xlane.f32.xlu0 %v3003_v61  ;;  %v3911_v3 = vpop.f32.mrf.mxu1 }
 0xf42   :  { %v2997_v1 = vmul.f32 30.0, %v3911_v3  ;;  %3101 = vst [vmem:[%s4741_s4 + $0x18] sm:$0xff] %v3911_v3  ;;  %v3002_v7 = vsel %vm64_vm0, %v2994_v62, -1e+30 }
 0xf43   :  { %3010 = vmax.xlane.f32.xlu1 %v3002_v7  ;;  %v2965_v5 = vpop.f32.mrf.mxu1 }
 0xf44   :  { %v2996_v2 = vmul.f32 30.0, %v2965_v5  ;;  %3100 = vst [vmem:[%s4741_s4 + $0x10] sm:$0xff] %v2965_v5  ;;  %v3005_v27 = vsel %vm64_vm0, %v2997_v1, -1e+30 }
 0xf45   :  { %3016 = vmax.xlane.f32.xlu0 %v3005_v27  ;;  %v3914_v28 = vpop.f32.mrf.mxu1 }
 0xf46   :  { %3103 = vst [vmem:[%s4741_s4 + $0x28] sm:$0xff] %v3914_v28  ;;  %v2999_v30 = vmul.f32 30.0, %v3914_v28  ;;  %v3004_v31 = vsel %vm64_vm0, %v2996_v2, -1e+30 }
 0xf47   :  { %v2975_v29 = vpop.f32.mrf.mxu1 }
 0xf48   :  { %3102 = vst [vmem:[%s4741_s4 + $0x20] sm:$0xff] %v2975_v29  ;;  %v2998_v34 = vmul.f32 30.0, %v2975_v29  ;;  %v3007_v35 = vsel %vm64_vm0, %v2999_v30, -1e+30 }
 0xf49   :  { %3014 = vmax.xlane.f32.xlu0 %v3004_v31  ;;  %v3917_v32 = vpop.f32.mrf.mxu1 }
 0xf4a   :  { %3105 = vst [vmem:[%s4741_s4 + $0x38] sm:$0xff] %v3917_v32  ;;  %v3006_v37 = vsel %vm64_vm0, %v2998_v34, -1e+30  ;;  %v3001_v10 = vmul.f32 30.0, %v3917_v32 }
 0xf4b   :  { %v2985_v33 = vpop.f32.mrf.mxu1 }
 0xf4c   :  { %3104 = vst [vmem:[%s4741_s4 + $0x30] sm:$0xff] %v2985_v33  ;;  %v3000_v36 = vmul.f32 30.0, %v2985_v33  ;;  %v3009_v39 = vsel %vm64_vm0, %v3001_v10, -1e+30 }
 0xf4d   :  { %3020 = vmax.xlane.f32.xlu0 %v3007_v35 }
 0xf4e   :  { %v3008_v38 = vsel %vm64_vm0, %v3000_v36, -1e+30 }
 0xf51   :  { %3018 = vmax.xlane.f32.xlu0 %v3006_v37 }
 0xf55   :  { %3022 = vmax.xlane.f32.xlu0 %v3008_v38 }
 0xf59   :  { %3024 = vmax.xlane.f32.xlu0 %v3009_v39 }
 0xfca   :  { %v3013_v40 = vpop.xlane.xlu0 %3012 }
 0xfcb   :  { %v3027_v41 = vsub.f32 %v3003_v61, %v3013_v40 }
 0xfcc   :  { %v3011_v42 = vpop.xlane.xlu1 %3010 }
 0xfcd   :  { %v3036_v43 = vmul.f32 1.442695, %v3027_v41  ;;  %v3026_v58 = vsub.f32 %v3002_v7, %v3011_v42 }
 0xfce   :  { %v3017_v44 = vpop.xlane.xlu0 %3016 }
 0xfcf   :  { %4075 = vpow2.f32 %v3036_v43  ;;  %v3034_v45 = vmul.f32 1.442695, %v3026_v58  ;;  %v3029_v46 = vsub.f32 %v3005_v27, %v3017_v44 }
 0xfd1   :  { %4077 = vpow2.f32 %v3034_v45  ;;  %v3040_v47 = vmul.f32 1.442695, %v3029_v46 }
 0xfd2   :  { %v3015_v48 = vpop.xlane.xlu0 %3014 }
 0xfd3   :  { %4079 = vpow2.f32 %v3040_v47  ;;  %v3028_v49 = vsub.f32 %v3004_v31, %v3015_v48 }
 0xfd5   :  { %v3038_v50 = vmul.f32 1.442695, %v3028_v49 }
 0xfd6   :  { %v3021_v51 = vpop.xlane.xlu0 %3020 }
 0xfd7   :  { %4081 = vpow2.f32 %v3038_v50  ;;  %v3031_v9 = vsub.f32 %v3007_v35, %v3021_v51 }
 0xfd9   :  { %v3044_v52 = vmul.f32 1.442695, %v3031_v9 }
 0xfda   :  { %v3019_v53 = vpop.xlane.xlu0 %3018 }
 0xfdb   :  { %4083 = vpow2.f32 %v3044_v52  ;;  %v3030_v54 = vsub.f32 %v3006_v37, %v3019_v53 }
 0xfdc   :  { %v4076_v55 = vpop.eup %4075 }
 0xfdd   :  { %v3042_v56 = vmul.f32 1.442695, %v3030_v54  ;;  %3052 = vadd.xlane.f32.xlu1 %v4076_v55 }
 0xfde   :  { %v4078_v57 = vpop.eup %4077  ;;  %v3023_v59 = vpop.xlane.xlu0 %3022 }
 0xfdf   :  { %4085 = vpow2.f32 %v3042_v56  ;;  %v3032_v60 = vsub.f32 %v3008_v38, %v3023_v59  ;;  %3050 = vadd.xlane.f32.xlu0 %v4078_v57 }
 0xfe0   :  { %v4080_v63 = vpop.eup %4079 }
 0xfe1   :  { %v3046_v4 = vmul.f32 1.442695, %v3032_v60  ;;  %3056 = vadd.xlane.f32.xlu1 %v4080_v63 }
 0xfe2   :  { %v3025_v6 = vpop.xlane.xlu0 %3024 }
 0xfe3   :  { %4087 = vpow2.f32 %v3046_v4  ;;  %v3033_v0 = vsub.f32 %v3009_v39, %v3025_v6 }
 0xfe4   :  { %v4082_v8 = vpop.eup %4081 }
 0xfe5   :  { %v3048_v11 = vmul.f32 1.442695, %v3033_v0  ;;  %3054 = vadd.xlane.f32.xlu0 %v4082_v8 }
 0xfe7   :  { %4089 = vpow2.f32 %v3048_v11 }
 0xfe8   :  { %v4084_v12 = vpop.eup %4083 }
 0xfe9   :  { %3060 = vadd.xlane.f32.xlu1 %v4084_v12 }
 0xfec   :  { %v4086_v13 = vpop.eup %4085 }
 0xfed   :  { %3058 = vadd.xlane.f32.xlu0 %v4086_v13 }
 0xff0   :  { %v4088_v14 = vpop.eup %4087 }
 0xff1   :  { %3062 = vadd.xlane.f32.xlu0 %v4088_v14 }
 0xff4   :  { %v4090_v15 = vpop.eup %4089 }
 0xff5   :  { %3064 = vadd.xlane.f32.xlu1 %v4090_v15 }
0x1066   :  { %v3053_v16 = vpop.xlane.xlu1 %3052 }
0x1067   :  { %4091 = vrcp.f32 %v3053_v16 }
0x1068   :  { %v3051_v17 = vpop.xlane.xlu0 %3050 }
0x1069   :  { %4093 = vrcp.f32 %v3051_v17 }
0x106a   :  { %v3057_v18 = vpop.xlane.xlu1 %3056 }
0x106b   :  { %4095 = vrcp.f32 %v3057_v18 }
0x106e   :  { %v3055_v19 = vpop.xlane.xlu0 %3054 }
0x106f   :  { %4097 = vrcp.f32 %v3055_v19 }
0x1072   :  { %v3061_v20 = vpop.xlane.xlu1 %3060 }
0x1073   :  { %4099 = vrcp.f32 %v3061_v20 }
0x1074   :  { %v4092_v21 = vpop.eup %4091 }
0x1075   :  { %v3083_v22 = vmul.f32 %v4092_v21, %v4076_v55 }
0x1076   :  { %v4094_v23 = vpop.eup %4093  ;;  %v3059_v24 = vpop.xlane.xlu0 %3058 }
0x1077   :  { %3091 = vst [vmem:[%s4742_s3 + $0x8] sm:$0xff] %v3083_v22  ;;  %v3082_v25 = vmul.f32 %v4094_v23, %v4078_v57  ;;  %4101 = vrcp.f32 %v3059_v24 }
0x1078   :  { %v4096_v26 = vpop.eup %4095 }
0x1079   :  { %3090 = vst [vmem:[%s4742_s3] sm:$0xff] %v3082_v25  ;;  %v3085_v62 = vmul.f32 %v4096_v26, %v4080_v63 }
0x107a   :  { %v3063_v61 = vpop.xlane.xlu0 %3062 }
0x107b   :  { %3093 = vst [vmem:[%s4742_s3 + $0x18] sm:$0xff] %v3085_v62  ;;  %4103 = vrcp.f32 %v3063_v61 }
0x107c   :  { %v4098_v3 = vpop.eup %4097 }
0x107d   :  { %v3084_v1 = vmul.f32 %v4098_v3, %v4082_v8 }
0x107e   :  { %v3065_v7 = vpop.xlane.xlu1 %3064 }
0x107f   :  { %3092 = vst [vmem:[%s4742_s3 + $0x10] sm:$0xff] %v3084_v1  ;;  %4105 = vrcp.f32 %v3065_v7 }
0x1080   :  { %v4100_v5 = vpop.eup %4099 }
0x1081   :  { %v3087_v2 = vmul.f32 %v4100_v5, %v4084_v12 }
0x1083   :  { %3095 = vst [vmem:[%s4742_s3 + $0x28] sm:$0xff] %v3087_v2 }
0x1084   :  { %v4102_v27 = vpop.eup %4101 }
0x1085   :  { %v3086_v28 = vmul.f32 %v4102_v27, %v4086_v13 }
0x1087   :  { %3094 = vst [vmem:[%s4742_s3 + $0x20] sm:$0xff] %v3086_v28 }
0x1088   :  { %v4104_v29 = vpop.eup %4103 }
0x1089   :  { %v3088_v30 = vmul.f32 %v4104_v29, %v4088_v14 }
0x108b   :  { %3096 = vst [vmem:[%s4742_s3 + $0x30] sm:$0xff] %v3088_v30 }
0x108c   :  { %v4106_v31 = vpop.eup %4105 }
0x108d   :  { %v3089_v32 = vmul.f32 %v4106_v31, %v4090_v15 }
0x108f   :  { %3097 = vst [vmem:[%s4742_s3 + $0x38] sm:$0xff] %v3089_v32 }

</bundles_post_ra>
